<compile_context>
chip_gen: v6e
topology: v6e:2x2x1
jax: 0.10.0
libtpu: 0.0.40
codegen_flags: <defaults>
</compile_context>

<pallas_src>
import jax
import jax.numpy as jnp
from jax import lax
from jax.experimental import pallas as pl
from jax.experimental.pallas import tpu as pltpu


# ---------------------------------------------------------------------------
# Tile selection helpers
# ---------------------------------------------------------------------------

def _tile_target(itemsize: int) -> int:
    """Dtype-aware tile edge (elements), ~1 MiB f32-equivalent byte budget.

    f32 -> 512, bf16/fp16 -> 1024, int8/fp8 -> 1024 (capped), f64 -> 256.
    Always a multiple of 128 so stores stay lane-dense and sublane packing
    (8/16/32 rows per vreg) is respected.
    """
    target = (512 * 4) // max(int(itemsize), 1)
    return int(max(256, min(target, 1024)))


def _pick_tile(extent: int, target: int) -> int:
    """Pick a block edge for `extent`.

    * Full extent if it already fits (always a legal block dim).
    * Otherwise the largest 128-multiple <= target that divides `extent`
      exactly (no masked edge stores on that axis).
    * Otherwise the largest 128-multiple <= target (fewest grid steps; the
      single partial edge tile is handled by Pallas masking).
    """
    if extent <= target:
        return extent
    for cand in range(target, 127, -128):
        if extent % cand == 0:
            return cand
    return target


# ---------------------------------------------------------------------------
# Standalone relayout kernel: (B, S, D) -> (B, D, S)
# ---------------------------------------------------------------------------

def _transpose_tile_kernel(x_ref, o_ref):
    # x_ref: (TS, TD) input tile in VMEM; o_ref: (TD, TS) output tile.
    # Single XLU transpose of the resident tile.
    # TODO(synk): try pltpu.einshape("sd->ds", ...) here and compare bundles.
    o_ref[...] = jnp.swapaxes(x_ref[...], 0, 1)


def pallas_transpose_1_2(x: jax.Array, *, input_buffers: int = 2) -> jax.Array:
    """torch.Tensor.transpose(1, 2) for a rank-3 (B, S, D) array -> (B, D, S).

    `input_buffers`: pipeline depth of the input BlockSpec. Leave at 2 (the
    default double buffer); bump to 3 on v7x only if a bundle dump shows
    exposed DMA latency (costs one extra tile of VMEM).
    """
    B, S, D = x.shape
    itemsize = jnp.dtype(x.dtype).itemsize
    target = _tile_target(itemsize)

    ts = _pick_tile(S, target)
    td = _pick_tile(D, target)
    n_s = pl.cdiv(S, ts)
    n_d = pl.cdiv(D, td)

    tile_bytes = ts * td * itemsize
    vmem_limit = int(min(max((input_buffers + 4) * tile_bytes, 4 * 1024 * 1024),
                         32 * 1024 * 1024))

    in_spec_kwargs = {}
    if input_buffers != 2:
        in_spec_kwargs["pipeline_mode"] = pl.Buffered(input_buffers)

    return pl.pallas_call(
        _transpose_tile_kernel,
        out_shape=jax.ShapeDtypeStruct((B, D, S), x.dtype),
        grid_spec=pltpu.PrefetchScalarGridSpec(
            num_scalar_prefetch=0,
            # Grid order (B, D-tiles, S-tiles): the innermost axis sweeps S,
            # so consecutive grid steps write adjacent contiguous regions of
            # the (B, D, S) output for a fixed D row-block.
            grid=(B, n_d, n_s),
            in_specs=[pl.BlockSpec((None, ts, td), lambda b, j, i: (b, i, j),
                                   **in_spec_kwargs)],
            out_specs=pl.BlockSpec((None, td, ts), lambda b, j, i: (b, j, i)),
        ),
        compiler_params=pltpu.CompilerParams(
            # All axes write disjoint output tiles -> fully parallel; lets
            # v7x shard the tile axes across its 2 TensorCores even for B=1.
            dimension_semantics=("parallel", "parallel", "parallel"),
            vmem_limit_bytes=vmem_limit,
        ),
        cost_estimate=pl.CostEstimate(
            flops=0,
            transcendentals=0,
            bytes_accessed=2 * B * S * D * itemsize,
        ),
    )(x)


# ---------------------------------------------------------------------------
# Structural fix (top review item): fold the transpose into the consumer.
# ---------------------------------------------------------------------------

def _transpose_linear_kernel(x_ref, w_ref, b_ref, o_ref):
    # x_ref: (C, TS) conv-layout tile; w_ref: (H, C); b_ref: (1, H);
    # o_ref: (TS, H). Contract over C with the LHS contraction on dim 0: the
    # MXU takes either orientation, so the (TS, C) transposed tile is never
    # materialized anywhere (VMEM or HBM).
    acc = lax.dot_general(
        x_ref[...], w_ref[...],
        dimension_numbers=(((0,), (1,)), ((), ())),
        preferred_element_type=jnp.float32,
    )
    o_ref[...] = (acc + b_ref[...].astype(jnp.float32)).astype(o_ref.dtype)


def pallas_transpose_into_linear(x: jax.Array, w: jax.Array, b: jax.Array) -> jax.Array:
    """Computes Linear(swapaxes(x, 1, 2)) without materializing the transpose.

    x: (B, C, S) conv/TemporalBlock output (channels-major),
    w: (H, C), b: (H,) -- the first Linear of the downstream consumer
    (e.g. the transformer encoder's in-projection, d_model = C).
    Returns (B, S, H) = einsum('bcs,hc->bsh', x, w) + b.
    """
    B, C, S = x.shape
    H, C2 = w.shape
    assert C2 == C, (w.shape, x.shape)
    itemsize = jnp.dtype(x.dtype).itemsize

    ts = _pick_tile(S, 512)
    n_s = pl.cdiv(S, ts)
    b2 = b.reshape(1, H)

    return pl.pallas_call(
        _transpose_linear_kernel,
        out_shape=jax.ShapeDtypeStruct((B, S, H), x.dtype),
        grid_spec=pltpu.PrefetchScalarGridSpec(
            num_scalar_prefetch=0,
            grid=(B, n_s),
            in_specs=[
                pl.BlockSpec((None, C, ts), lambda bb, i: (bb, 0, i)),
                pl.BlockSpec((H, C), lambda bb, i: (0, 0)),
                pl.BlockSpec((1, H), lambda bb, i: (0, 0)),
            ],
            out_specs=pl.BlockSpec((None, ts, H), lambda bb, i: (bb, i, 0)),
        ),
        compiler_params=pltpu.CompilerParams(
            dimension_semantics=("parallel", "parallel"),
        ),
        cost_estimate=pl.CostEstimate(
            flops=2 * B * S * C * H,
            transcendentals=0,
            bytes_accessed=(B * C * S + H * C + H + B * S * H) * itemsize,
        ),
    )(x, w, b2)


# ---------------------------------------------------------------------------
# Module-level wrapper (matches PyTorch `.transpose(1, 2)` semantics)
# ---------------------------------------------------------------------------

class Transpose:
    """JAX/Pallas port of the PyTorch `x.transpose(dim1, dim2)` re-layout.

    NOTE (top perf-review item): when the transposed result directly feeds a
    matmul / Linear (as in ConvTransformer.forward, where the (B, C, S) conv
    output is transposed to (B, S, C) and consumed by the transformer
    encoder's in-projection), prefer `pallas_transpose_into_linear`, which
    folds the axis swap into the dot_general and never materializes the
    transposed tensor in HBM — a standalone relayout can never beat not
    running it.
    """

    # Below ~1 MiB per (S, D) slab the fixed per-grid-step (~0.35 us) and
    # launch overhead dwarf the copy; plain XLA transpose wins (and may fuse
    # into the consumer). Deliberately per-slab (ignores B): tiny slabs with
    # large B still want the XLA path for tile legality / fusion.
    _MIN_PALLAS_BYTES = 1 << 20

    def __init__(self, dim1: int, dim2: int, min_pallas_bytes: int = _MIN_PALLAS_BYTES):
        self.dim1 = dim1
        self.dim2 = dim2
        self.min_pallas_bytes = min_pallas_bytes

    def __call__(self, x: jax.Array) -> jax.Array:
        # Kernel is specialized for the rank-3 (1, 2) swap used in the parent
        # model; other axis pairs fall back to plain JAX.
        if x.ndim == 3 and {self.dim1, self.dim2} == {1, 2}:
            _, S, D = x.shape
            slab_bytes = S * D * jnp.dtype(x.dtype).itemsize
            if slab_bytes >= self.min_pallas_bytes:
                return pallas_transpose_1_2(x)
            return jnp.swapaxes(x, 1, 2)  # small-shape / fusion bailout
        # TODO(synk): generic dim-pair transpose kernel (only glue here).
        return jnp.swapaxes(x, self.dim1, self.dim2)


if __name__ == "__main__":
    key = jax.random.PRNGKey(0)
    k1, k2, k3, k4, k5, k6 = jax.random.split(key, 6)

    mod = Transpose(1, 2)

    # 1) Model-realistic tiny shape (seq=8, channels=32): dispatch takes the
    #    small-shape bailout (XLA transpose; no kernel launch).
    x_small = jax.random.normal(k1, (2, 8, 32), dtype=jnp.float32)
    y_small = mod(x_small)
    jax.block_until_ready(y_small)
    assert y_small.shape == (2, 32, 8), y_small.shape
    assert jnp.array_equal(y_small, jnp.swapaxes(x_small, 1, 2))

    # 2) Tiled Pallas path, f32, with a masked partial S edge tile
    #    (600 = 512 + 88; no 128-multiple divides 600).
    x_f32 = jax.random.normal(k2, (2, 600, 256), dtype=jnp.float32)
    y_f32 = pallas_transpose_1_2(x_f32)
    jax.block_until_ready(y_f32)
    assert y_f32.shape == (2, 256, 600), y_f32.shape
    assert jnp.array_equal(y_f32, jnp.swapaxes(x_f32, 1, 2)), "f32 mismatch"

    # 3) Divisor-preferring tile selection through the class (Pallas path):
    #    S=1280 -> ts=256 (exact divisor), all stores unmasked & lane-dense.
    x_div = jax.random.normal(k3, (1, 1280, 256), dtype=jnp.float32)
    y_div = mod(x_div)
    jax.block_until_ready(y_div)
    assert y_div.shape == (1, 256, 1280), y_div.shape
    assert jnp.array_equal(y_div, jnp.swapaxes(x_div, 1, 2)), "divisor-tile mismatch"

    # 4) bf16 path: dtype-aware tile target (1024) -> full-extent blocks here.
    x_bf16 = jax.random.normal(k4, (2, 640, 128), dtype=jnp.float32).astype(jnp.bfloat16)
    y_bf16 = pallas_transpose_1_2(x_bf16)
    jax.block_until_ready(y_bf16)
    assert y_bf16.shape == (2, 128, 640), y_bf16.shape
    assert jnp.array_equal(y_bf16, jnp.swapaxes(x_bf16, 1, 2)), "bf16 mismatch"

    # 5) Structural fix (top review item): fold the transpose into the
    #    downstream Linear. Shapes match the parent model's last level
    #    (out_channels = d_model = 32) at a small sequence length.
    B, C, S, H = 2, 32, 48, 32
    x_conv = jax.random.normal(k5, (B, C, S), dtype=jnp.float32)
    w = jax.random.normal(k6, (H, C), dtype=jnp.float32) * 0.1
    bias = jnp.linspace(-0.5, 0.5, H, dtype=jnp.float32)
    y_fused = pallas_transpose_into_linear(x_conv, w, bias)
    jax.block_until_ready(y_fused)
    y_ref = jnp.swapaxes(x_conv, 1, 2) @ w.T + bias
    assert y_fused.shape == (B, S, H), y_fused.shape
    assert jnp.allclose(y_fused, y_ref, atol=1e-4, rtol=1e-4), "fused mismatch"

    print("KERNEL_OK")
</pallas_src>

<mosaic_0001>
module attributes {stable_mosaic.version = 11 : i64} {
  func.func @_transpose_tile_kernel(%arg0: i32, %arg1: i32, %arg2: i32, %arg3: memref<1x512x256xf32, #tpu.memory_space<vmem>>, %arg4: memref<1x256x512xf32, #tpu.memory_space<vmem>>) attributes {dimension_semantics = [#tpu.dimension_semantics<parallel>, #tpu.dimension_semantics<parallel>, #tpu.dimension_semantics<parallel>], iteration_bounds = array<i64: 2, 1, 2>, scalar_prefetch = 0 : i64, scratch_operands = 0 : i64, tpu.core_type = #tpu.core_type<tc>, window_params = [{transform_indices = @transform_0, window_bounds = array<i64: 1, 512, 256>}, {transform_indices = @transform_1, window_bounds = array<i64: 1, 256, 512>}]} {
    %c0 = arith.constant 0 : index
    %c0_0 = arith.constant 0 : index
    %c0_1 = arith.constant 0 : index
    %0 = vector.load %arg3[%c0, %c0_0, %c0_1] : memref<1x512x256xf32, #tpu.memory_space<vmem>>, vector<1x512x256xf32>
    %1 = vector.shape_cast %0 : vector<1x512x256xf32> to vector<512x256xf32>
    %2 = tpu.transpose %1, [1, 0] : vector<512x256xf32> -> vector<256x512xf32>
    %c0_2 = arith.constant 0 : index
    %c0_3 = arith.constant 0 : index
    %c0_4 = arith.constant 0 : index
    %3 = vector.load %arg4[%c0_2, %c0_3, %c0_4] : memref<1x256x512xf32, #tpu.memory_space<vmem>>, vector<1x256x512xf32>
    %4 = vector.shape_cast %3 : vector<1x256x512xf32> to vector<256x512xf32>
    %5 = vector.shape_cast %2 : vector<256x512xf32> to vector<1x256x512xf32>
    tpu.vector_store %arg4[%c0_2, %c0_3, %c0_4], %5 {strides = array<i32>} : memref<1x256x512xf32, #tpu.memory_space<vmem>>, vector<1x256x512xf32>,
    return
  }
  func.func @transform_0(%arg0: i32, %arg1: i32, %arg2: i32) -> (i32, i32, i32) {
    %c0_i32 = arith.constant 0 : i32
    return %arg0, %arg2, %arg1 : i32, i32, i32
  }
  func.func @transform_1(%arg0: i32, %arg1: i32, %arg2: i32) -> (i32, i32, i32) {
    %c0_i32 = arith.constant 0 : i32
    return %arg0, %arg1, %arg2 : i32, i32, i32
  }
}

</mosaic_0001>

<bundles_post_ra>
// kernel: tpu_custom_call.1
= control target key start
LH: loop header
LB: loop body
LE: loop exit
PB: predicated region body
PF: predicated region fallthrough
CT: control target
= control target key end

     0   :  { %6 = vsyncpa [#allocation3], 0  ;;  %s3305_s0 = inlined_call_operand.hbm [shape: f32[2,600,256], index: 0, kind: input, shape index: {}]   ;;  %s3306_s1 = inlined_call_operand.vmem [shape: f32[2,256,600], index: 1, kind: output, shape index: {}]  }
   0x1   :  { %8 = vsyncpa [#allocation3 + $0x1], 0  ;;  %s2023_s6 = smov 0   ;;  %s2025_s7 = smov 0  }
   0x2   :  { %s2027_s8 = smov 0   ;;  %s2029_s9 = smov 0  }
   0x3   :  { %s2031_s10 = smov 0   ;;  %s2033_s11 = smov 0  }
   0x4   :  { %s2035_s12 = smov 0   ;;  %s2037_s13 = smov 0  }
   0x5 LB: > { %s26_s14 = sadd.s32 1, %s1934_s11  ;;  %s33_s15 = sadd.s32 1, %s1938_s12  ;;  %s1942_s13 = sphi %s2037_s13, %s14_s13   ;;  %s1938_s12 = sphi %s2035_s12, %s3335_s12   ;;  %s1934_s11 = sphi %s2033_s11, %s3334_s11   ;;  %s1930_s10 = sphi %s2031_s10, %s3333_s10   ;;  %s1926_s9 = sphi %s2029_s9, %s3332_s9   ;;  %s1922_s8 = sphi %s2027_s8, %s3331_s8   ;;  %s1918_s7 = sphi %s2025_s7, %s3330_s7   ;;  %s1914_s6 = sphi %s2023_s6, %s3329_s6  }
   0x6   : > { %p27_p0 = scmp.ge.s32.totalorder %s26_s14, 2  ;;  %s1534_s16 = sadd.s32 4294967295, %s1942_s13  }
   0x7   : > { %p51_p1 = scmp.ne.s32.totalorder %s1922_s8, %s1918_s7  ;;  %p52_p2 = scmp.eq.s32.totalorder %s1942_s13, 0 }
   0x8   : > { %s3337_s14 = smov (%p27_p0, %s26_s14), 0  ;;  %s3339_s15 = smov (!%p27_p0, %s33_s15), %s1938_s12 }
   0x9   : > { %s38_s17 = ssub.s32 %s1934_s11, %s3337_s14  ;;  %p35_p3 = scmp.ge.s32.totalorder %s3339_s15, 2 }
   0xa   : > { %p57_p4 = scmp.ne.s32.totalorder %s1918_s7, %s1914_s6  ;;  %p53_p5 = por %p52_p2, %p51_p1 }
   0xb   : > { %p58_p6 = scmp.eq.s32.totalorder %s1534_s16, 0  ;;  %s3341_s15 = smov (%p35_p3, %s3339_s15), 0 }
   0xc   : > { %p85_p8 = scmp.eq.s32.totalorder %s1534_s16, 3  ;;  %s37_s19 = ssub.s32 %s1938_s12, %s3341_s15 }
   0xd   : > { %p2078_p7 = por %p58_p6, %p57_p4  ;;  %s44_s20 = sadd.s32 1, %s1922_s8 }
   0xe   : > { %s39_s21 = sor.u32 %s38_s17, %s37_s19  ;;  %p2088_p9 = por %p85_p8, %p51_p1 }
   0xf   : > { %p42_p10 = scmp.eq.s32.totalorder %s39_s21, 0  ;;  %p1537_p11 = scmp.ge.s32.totalorder %s1942_s13, 4 }
  0x11   : > { %s2093_s23 = scalar_select %p42_p10, %s1922_s8, %s44_s20  }
  0x12   : > { %107 = sbr.rel (%p1537_p11) target bundleno = 59 (0x3b), region = 16 }
  0x17   : > { %110 = sbr.rel (!%p53_p5) target bundleno = 59 (0x3b), region = 20  ;;  %s111_s24 = sand.u32 (%p53_p5), 1, %s1922_s8  }
  0x18   : > { %s1539_s25 = sshll.u32 (%p53_p5), %s1934_s11, 6  ;;  %s1538_s26 = sshll.u32 (%p53_p5), %s111_s24, 10 }
  0x19   : > { %s118_s27 = ssub.s32 (%p53_p5), 75, %s1539_s25  ;;  %s2101_s30 = scalar_lea.sflag (%p53_p5), [#allocation3], %s111_s24 }
  0x1a   : > { %p119_p12 = scmp.lt.s32.totalorder (%p53_p5), %s118_s27, 64  ;;  %s115_s2 = scalar_lea.vmem (%p53_p5), [#allocation2], %s1538_s26 }
  0x1c   : > { %s3343_s27 = smov (!%p119_p12, %s118_s27), 64 }
  0x1d   : > { %s2098_s28 = sshll.u32 %s3343_s27, 8 }
  0x1e   : > { %s124_s29 = ssub.s32 16384, %s2098_s28 }
  0x1f   : > { %125 = vsyncadd %s2101_s30, %s124_s29  ;;  %p1542_p13 = scmp.ne.s32.totalorder %s2098_s28, 0  ;;  %s1582_s3 = sshll.u32 %s1934_s11, 7 }
  0x20   : > { %s1587_s4 = smul.u32 150, %s1938_s12  ;;  %s134_s5 = sshll.u32 %s115_s2, 4  ;;  %s2107_s5 = int_to_ptr.vmem [resolvable:$true] %s134_s5 }
  0x21   : > { %s1790_s26 = scalar_lea.hbm %s3305_s0, 38400 }
  0x22   : > { %s130_s6 = sadd.s32 %s1587_s4, %s1582_s3 }
  0x23   : > { %s1544_s16 = sshll.u32 %s130_s6, 7 }
  0x24   : > { %s2112_s20 = scalar_lea.hbm %s3305_s0, %s1544_s16 }
  0x25   : > { %s1786_s21 = scalar_lea.hbm %s2112_s20, %s2098_s28 }
  0x26   : > { %p1787_p0 = scmp.ne.s32.totalorder %s2112_s20, %s1786_s21  ;;  %p1792_p3 = scmp.lt.s32.totalorder %s1790_s26, %s1786_s21 }
  0x28   : > { %p1788_p1 = pnand %p1787_p0, %p1542_p13 }
  0x2a   : > { %p1789_p2 = pneg %p1788_p1 }
  0x2c   : > { %p1794_p4 = pnand %p1792_p3, %p1789_p2 }
  0x2e   : > { %1797 = shalt.err (!%p1794_p4)
}
  0x2f   : > { %s1798_s27 = scalar_lea.vmem %s2107_s5, %s2098_s28  ;;  %s2008_s29 = smov [#allocation2]  }
  0x30   : > { %p1799_p5 = scmp.ne.s32.totalorder %s2107_s5, %s1798_s27  ;;  %s1802_s2 = sshll.u32 %s2008_s29, 4  ;;  %s1803_s2 = int_to_ptr.vmem [resolvable:$false] %s1802_s2 }
  0x31   : > { %s1804_s3 = scalar_lea.vmem %s1803_s2, 32768  ;;  %p1805_p10 = scmp.lt.s32.totalorder %s2107_s5, %s1803_s2 }
  0x32   : > { %p1800_p6 = pnand %p1799_p5, %p1542_p13  ;;  %p1806_p11 = scmp.lt.s32.totalorder %s1804_s3, %s1798_s27 }
  0x34   : > { %p1801_p8 = pneg %p1800_p6  ;;  %p1807_p12 = por %p1806_p11, %p1805_p10 }
  0x36   : > { %p1808_p0 = pnand %p1807_p12, %p1801_p8 }
  0x38   : > { %1811 = shalt.err (!%p1808_p0)
}
  0x39   : > { %s2009_s4 = smov 256   ;;  %s2010_s6 = smov 16  }
  0x3a   : > { %140 = dma.hbm_to_vmem [thread:$0]  (%p1542_p13), %s2112_s20, %s2098_s28, %s2107_s5, %s2101_s30, %s2009_s4, %s2009_s4, %s2010_s6  }
  0x3b PF: > { %p1547_p1 = scmp.ge.s32.totalorder %s1942_s13, 1  ;;  %p142_p2 = scmp.lt.s32.totalorder %s1942_s13, 5 }
  0x3d   : > { %p143_p3 = pnand %p1547_p1, %p142_p2 }
  0x3e   : > { %s148_s16 = sand.u32 (!%p143_p3), 1, %s1918_s7  }
  0x3f   : > { %146 = sbr.rel (%p143_p3) target bundleno = 706 (0x2c2), region = 24  ;;  %s2137_s17 = sshll.u32 (!%p143_p3), %s148_s16, 10 }
  0x40   : > { %s149_s19 = scalar_lea.sflag (!%p143_p3), [#allocation3], %s148_s16  ;;  %s2140_s21 = scalar_lea.vmem (!%p143_p3), [#allocation2], %s2137_s17 }
  0x44   : > { %1909 = dma.done.wait (%p2078_p7), %s149_s19, 16384  }
  0x45   : > { %1911 = vsyncadd (%p2078_p7), %s149_s19, 4294950912  ;;  %v184_v0 = vld [vmem:[%s2140_s21 + $0x8] sm:$0xff]  ;;  %v183_v1 = vld [vmem:[%s2140_s21] sm:$0xff]  ;;  %s2211_s18 = scalar_lea.vmem [#allocation4], %s2137_s17   ;;  %s1551_s28 = sshll.u32 (%p2088_p9), %s1926_s9, 2 }
  0x46   : > { %343 = vxpose.xlu1.b32.start [1/16] %v184_v0, 128  ;;  %311 = vxpose.xlu0.b32.start [1/16] %v183_v1, 128  ;;  %v186_v2 = vld [vmem:[%s2140_s21 + $0x18] sm:$0xff]  ;;  %v185_v3 = vld [vmem:[%s2140_s21 + $0x10] sm:$0xff]  ;;  %v188_v4 = vld [vmem:[%s2140_s21 + $0x28] sm:$0xff]  ;;  %s1588_s30 = smul.u32 (%p2088_p9), 160, %s1930_s10  ;;  %s704_s5 = ssub.s32 (%p2088_p9), 5, %s1551_s28 }
  0x47   : > { %v187_v5 = vld [vmem:[%s2140_s21 + $0x20] sm:$0xff]  ;;  %v190_v6 = vld [vmem:[%s2140_s21 + $0x38] sm:$0xff]  ;;  %v189_v7 = vld [vmem:[%s2140_s21 + $0x30] sm:$0xff]  ;;  %p705_p7 = scmp.lt.s32.totalorder (%p2088_p9), %s704_s5, 4 }
  0x48   : > { %v192_v8 = vld [vmem:[%s2140_s21 + $0x48] sm:$0xff]  ;;  %v191_v9 = vld [vmem:[%s2140_s21 + $0x40] sm:$0xff]  ;;  %v194_v10 = vld [vmem:[%s2140_s21 + $0x58] sm:$0xff]  ;;  %s712_s20 = sadd.s32 (%p2088_p9), %s1588_s30, %s1551_s28 }
  0x49   : > { %v193_v11 = vld [vmem:[%s2140_s21 + $0x50] sm:$0xff]  ;;  %v196_v12 = vld [vmem:[%s2140_s21 + $0x68] sm:$0xff]  ;;  %v195_v13 = vld [vmem:[%s2140_s21 + $0x60] sm:$0xff]  ;;  %s1554_s24 = sshll.u32 (%p2088_p9), %s712_s20, 3 }
  0x4a   : > { %344 = vxpose.xlu1.b32.cont [2/16] %v186_v2, 128  ;;  %312 = vxpose.xlu0.b32.cont [2/16] %v185_v3, 128  ;;  %v198_v14 = vld [vmem:[%s2140_s21 + $0x78] sm:$0xff]  ;;  %v197_v15 = vld [vmem:[%s2140_s21 + $0x70] sm:$0xff]  ;;  %v200_v16 = vld [vmem:[%s2140_s21 + $0x88] sm:$0xff]  ;;  %s2412_s27 = scalar_lea.vmem (%p2088_p9), %s3306_s1, %s1554_s24  }
  0x4b   : > { %v199_v17 = vld [vmem:[%s2140_s21 + $0x80] sm:$0xff]  ;;  %v202_v18 = vld [vmem:[%s2140_s21 + $0x98] sm:$0xff]  ;;  %v201_v19 = vld [vmem:[%s2140_s21 + $0x90] sm:$0xff] }
  0x4c   : > { %v204_v20 = vld [vmem:[%s2140_s21 + $0xa8] sm:$0xff]  ;;  %v203_v21 = vld [vmem:[%s2140_s21 + $0xa0] sm:$0xff]  ;;  %v206_v22 = vld [vmem:[%s2140_s21 + $0xb8] sm:$0xff] }
  0x4d   : > { %v205_v23 = vld [vmem:[%s2140_s21 + $0xb0] sm:$0xff]  ;;  %v208_v24 = vld [vmem:[%s2140_s21 + $0xc8] sm:$0xff]  ;;  %v207_v25 = vld [vmem:[%s2140_s21 + $0xc0] sm:$0xff] }
  0x4e   : > { %345 = vxpose.xlu1.b32.cont [3/16] %v188_v4, 128  ;;  %313 = vxpose.xlu0.b32.cont [3/16] %v187_v5, 128  ;;  %v210_v26 = vld [vmem:[%s2140_s21 + $0xd8] sm:$0xff]  ;;  %v209_v27 = vld [vmem:[%s2140_s21 + $0xd0] sm:$0xff]  ;;  %v212_v28 = vld [vmem:[%s2140_s21 + $0xe8] sm:$0xff] }
  0x4f   : > { %v211_v29 = vld [vmem:[%s2140_s21 + $0xe0] sm:$0xff]  ;;  %v214_v30 = vld [vmem:[%s2140_s21 + $0xf8] sm:$0xff]  ;;  %v213_v31 = vld [vmem:[%s2140_s21 + $0xf0] sm:$0xff] }
  0x50   : > { %v216_v32 = vld [vmem:[%s2140_s21 + $0x108] sm:$0xff]  ;;  %v215_v33 = vld [vmem:[%s2140_s21 + $0x100] sm:$0xff]  ;;  %v218_v34 = vld [vmem:[%s2140_s21 + $0x118] sm:$0xff] }
  0x51   : > { %v217_v35 = vld [vmem:[%s2140_s21 + $0x110] sm:$0xff]  ;;  %v220_v36 = vld [vmem:[%s2140_s21 + $0x128] sm:$0xff]  ;;  %v219_v37 = vld [vmem:[%s2140_s21 + $0x120] sm:$0xff] }
  0x52   : > { %346 = vxpose.xlu1.b32.cont [4/16] %v190_v6, 128  ;;  %314 = vxpose.xlu0.b32.cont [4/16] %v189_v7, 128  ;;  %v222_v38 = vld [vmem:[%s2140_s21 + $0x138] sm:$0xff]  ;;  %v221_v39 = vld [vmem:[%s2140_s21 + $0x130] sm:$0xff]  ;;  %v224_v40 = vld [vmem:[%s2140_s21 + $0x148] sm:$0xff] }
  0x53   : > { %v223_v41 = vld [vmem:[%s2140_s21 + $0x140] sm:$0xff]  ;;  %v226_v42 = vld [vmem:[%s2140_s21 + $0x158] sm:$0xff]  ;;  %v225_v43 = vld [vmem:[%s2140_s21 + $0x150] sm:$0xff] }
  0x54   : > { %v228_v44 = vld [vmem:[%s2140_s21 + $0x168] sm:$0xff]  ;;  %v227_v45 = vld [vmem:[%s2140_s21 + $0x160] sm:$0xff]  ;;  %v230_v46 = vld [vmem:[%s2140_s21 + $0x178] sm:$0xff] }
  0x55   : > { %v229_v47 = vld [vmem:[%s2140_s21 + $0x170] sm:$0xff]  ;;  %v232_v48 = vld [vmem:[%s2140_s21 + $0x188] sm:$0xff]  ;;  %v231_v49 = vld [vmem:[%s2140_s21 + $0x180] sm:$0xff] }
  0x56   : > { %347 = vxpose.xlu1.b32.cont [5/16] %v192_v8, 128  ;;  %315 = vxpose.xlu0.b32.cont [5/16] %v191_v9, 128  ;;  %v234_v50 = vld [vmem:[%s2140_s21 + $0x198] sm:$0xff]  ;;  %v233_v51 = vld [vmem:[%s2140_s21 + $0x190] sm:$0xff]  ;;  %v236_v52 = vld [vmem:[%s2140_s21 + $0x1a8] sm:$0xff] }
  0x57   : > { %v235_v53 = vld [vmem:[%s2140_s21 + $0x1a0] sm:$0xff]  ;;  %v238_v54 = vld [vmem:[%s2140_s21 + $0x1b8] sm:$0xff]  ;;  %v237_v55 = vld [vmem:[%s2140_s21 + $0x1b0] sm:$0xff] }
  0x58   : > { %v240_v56 = vld [vmem:[%s2140_s21 + $0x1c8] sm:$0xff]  ;;  %v239_v57 = vld [vmem:[%s2140_s21 + $0x1c0] sm:$0xff]  ;;  %v242_v58 = vld [vmem:[%s2140_s21 + $0x1d8] sm:$0xff] }
  0x59   : > { %v241_v59 = vld [vmem:[%s2140_s21 + $0x1d0] sm:$0xff]  ;;  %v244_v60 = vld [vmem:[%s2140_s21 + $0x1e8] sm:$0xff]  ;;  %v243_v61 = vld [vmem:[%s2140_s21 + $0x1e0] sm:$0xff] }
  0x5a   : > { %348 = vxpose.xlu1.b32.cont [6/16] %v194_v10, 128  ;;  %316 = vxpose.xlu0.b32.cont [6/16] %v193_v11, 128  ;;  %v246_v62 = vld [vmem:[%s2140_s21 + $0x1f8] sm:$0xff]  ;;  %v245_v63 = vld [vmem:[%s2140_s21 + $0x1f0] sm:$0xff]  ;;  %v248_v2 = vld [vmem:[%s2140_s21 + $0x208] sm:$0xff] }
  0x5b   : > { %v247_v3 = vld [vmem:[%s2140_s21 + $0x200] sm:$0xff]  ;;  %v250_v6 = vld [vmem:[%s2140_s21 + $0x218] sm:$0xff]  ;;  %v249_v7 = vld [vmem:[%s2140_s21 + $0x210] sm:$0xff] }
  0x5c   : > { %v252_v10 = vld [vmem:[%s2140_s21 + $0x228] sm:$0xff]  ;;  %v251_v11 = vld [vmem:[%s2140_s21 + $0x220] sm:$0xff] }
  0x5e   : > { %349 = vxpose.xlu1.b32.cont [7/16] %v196_v12, 128  ;;  %317 = vxpose.xlu0.b32.cont [7/16] %v195_v13, 128 }
  0x62   : > { %350 = vxpose.xlu1.b32.cont [8/16] %v198_v14, 128  ;;  %318 = vxpose.xlu0.b32.cont [8/16] %v197_v15, 128  ;;  %v254_v14 = vld [vmem:[%s2140_s21 + $0x238] sm:$0xff]  ;;  %v253_v15 = vld [vmem:[%s2140_s21 + $0x230] sm:$0xff] }
  0x66   : > { %351 = vxpose.xlu1.b32.cont [9/16] %v200_v16, 128  ;;  %319 = vxpose.xlu0.b32.cont [9/16] %v199_v17, 128 }
  0x6a   : > { %352 = vxpose.xlu1.b32.cont [10/16] %v202_v18, 128  ;;  %320 = vxpose.xlu0.b32.cont [10/16] %v201_v19, 128  ;;  %v256_v18 = vld [vmem:[%s2140_s21 + $0x248] sm:$0xff]  ;;  %v255_v19 = vld [vmem:[%s2140_s21 + $0x240] sm:$0xff] }
  0x6e   : > { %353 = vxpose.xlu1.b32.cont [11/16] %v204_v20, 128  ;;  %321 = vxpose.xlu0.b32.cont [11/16] %v203_v21, 128 }
  0x72   : > { %354 = vxpose.xlu1.b32.cont [12/16] %v206_v22, 128  ;;  %322 = vxpose.xlu0.b32.cont [12/16] %v205_v23, 128  ;;  %v258_v22 = vld [vmem:[%s2140_s21 + $0x258] sm:$0xff]  ;;  %v257_v23 = vld [vmem:[%s2140_s21 + $0x250] sm:$0xff] }
  0x76   : > { %355 = vxpose.xlu1.b32.cont [13/16] %v208_v24, 128  ;;  %323 = vxpose.xlu0.b32.cont [13/16] %v207_v25, 128 }
  0x7a   : > { %356 = vxpose.xlu1.b32.cont [14/16] %v210_v26, 128  ;;  %324 = vxpose.xlu0.b32.cont [14/16] %v209_v27, 128  ;;  %v260_v26 = vld [vmem:[%s2140_s21 + $0x268] sm:$0xff]  ;;  %v259_v27 = vld [vmem:[%s2140_s21 + $0x260] sm:$0xff] }
  0x7e   : > { %357 = vxpose.xlu1.b32.cont [15/16] %v212_v28, 128  ;;  %325 = vxpose.xlu0.b32.cont [15/16] %v211_v29, 128 }
  0x82   : > { %358 = vxpose.xlu1.b32.end [16/16] %v214_v30, 128  ;;  %326 = vxpose.xlu0.b32.end [16/16] %v213_v31, 128  ;;  %v262_v30 = vld [vmem:[%s2140_s21 + $0x278] sm:$0xff]  ;;  %v261_v31 = vld [vmem:[%s2140_s21 + $0x270] sm:$0xff] }
  0x86   : > { %407 = vxpose.xlu1.b32.start [1/16] %v216_v32, 128  ;;  %375 = vxpose.xlu0.b32.start [1/16] %v215_v33, 128 }
  0x8a   : > { %408 = vxpose.xlu1.b32.cont [2/16] %v218_v34, 128  ;;  %376 = vxpose.xlu0.b32.cont [2/16] %v217_v35, 128  ;;  %v264_v34 = vld [vmem:[%s2140_s21 + $0x288] sm:$0xff]  ;;  %v263_v35 = vld [vmem:[%s2140_s21 + $0x280] sm:$0xff] }
  0x8e   : > { %409 = vxpose.xlu1.b32.cont [3/16] %v220_v36, 128  ;;  %377 = vxpose.xlu0.b32.cont [3/16] %v219_v37, 128 }
  0x92   : > { %410 = vxpose.xlu1.b32.cont [4/16] %v222_v38, 128  ;;  %378 = vxpose.xlu0.b32.cont [4/16] %v221_v39, 128  ;;  %v266_v38 = vld [vmem:[%s2140_s21 + $0x298] sm:$0xff]  ;;  %v265_v39 = vld [vmem:[%s2140_s21 + $0x290] sm:$0xff] }
  0x96   : > { %411 = vxpose.xlu1.b32.cont [5/16] %v224_v40, 128  ;;  %379 = vxpose.xlu0.b32.cont [5/16] %v223_v41, 128 }
  0x9a   : > { %412 = vxpose.xlu1.b32.cont [6/16] %v226_v42, 128  ;;  %380 = vxpose.xlu0.b32.cont [6/16] %v225_v43, 128  ;;  %v268_v42 = vld [vmem:[%s2140_s21 + $0x2a8] sm:$0xff]  ;;  %v267_v43 = vld [vmem:[%s2140_s21 + $0x2a0] sm:$0xff] }
  0x9e   : > { %413 = vxpose.xlu1.b32.cont [7/16] %v228_v44, 128  ;;  %381 = vxpose.xlu0.b32.cont [7/16] %v227_v45, 128 }
  0xa2   : > { %414 = vxpose.xlu1.b32.cont [8/16] %v230_v46, 128  ;;  %382 = vxpose.xlu0.b32.cont [8/16] %v229_v47, 128  ;;  %v270_v46 = vld [vmem:[%s2140_s21 + $0x2b8] sm:$0xff]  ;;  %v269_v47 = vld [vmem:[%s2140_s21 + $0x2b0] sm:$0xff] }
  0xa6   : > { %415 = vxpose.xlu1.b32.cont [9/16] %v232_v48, 128  ;;  %383 = vxpose.xlu0.b32.cont [9/16] %v231_v49, 128 }
  0xaa   : > { %416 = vxpose.xlu1.b32.cont [10/16] %v234_v50, 128  ;;  %384 = vxpose.xlu0.b32.cont [10/16] %v233_v51, 128  ;;  %v272_v50 = vld [vmem:[%s2140_s21 + $0x2c8] sm:$0xff]  ;;  %v271_v51 = vld [vmem:[%s2140_s21 + $0x2c0] sm:$0xff] }
  0xae   : > { %417 = vxpose.xlu1.b32.cont [11/16] %v236_v52, 128  ;;  %385 = vxpose.xlu0.b32.cont [11/16] %v235_v53, 128 }
  0xb2   : > { %418 = vxpose.xlu1.b32.cont [12/16] %v238_v54, 128  ;;  %386 = vxpose.xlu0.b32.cont [12/16] %v237_v55, 128  ;;  %v274_v54 = vld [vmem:[%s2140_s21 + $0x2d8] sm:$0xff]  ;;  %v273_v55 = vld [vmem:[%s2140_s21 + $0x2d0] sm:$0xff] }
  0xb6   : > { %419 = vxpose.xlu1.b32.cont [13/16] %v240_v56, 128  ;;  %387 = vxpose.xlu0.b32.cont [13/16] %v239_v57, 128 }
  0xba   : > { %420 = vxpose.xlu1.b32.cont [14/16] %v242_v58, 128  ;;  %388 = vxpose.xlu0.b32.cont [14/16] %v241_v59, 128  ;;  %v276_v58 = vld [vmem:[%s2140_s21 + $0x2e8] sm:$0xff]  ;;  %v275_v59 = vld [vmem:[%s2140_s21 + $0x2e0] sm:$0xff] }
  0xbe   : > { %421 = vxpose.xlu1.b32.cont [15/16] %v244_v60, 128  ;;  %389 = vxpose.xlu0.b32.cont [15/16] %v243_v61, 128 }
  0xc2   : > { %422 = vxpose.xlu1.b32.end [16/16] %v246_v62, 128  ;;  %v359_v0 = vpop.trf.xlu1  ;;  %390 = vxpose.xlu0.b32.end [16/16] %v245_v63, 128  ;;  %v327_v1 = vpop.trf.xlu0  ;;  %v278_v62 = vld [vmem:[%s2140_s21 + $0x2f8] sm:$0xff]  ;;  %v277_v63 = vld [vmem:[%s2140_s21 + $0x2f0] sm:$0xff] }
  0xc3   : > { %631 = vst [vmem:[%s2211_s18 + $0x200] sm:$0xff] %v359_v0  ;;  %567 = vst [vmem:[%s2211_s18] sm:$0xff] %v327_v1 }
  0xc6   : > { %471 = vxpose.xlu1.b32.start [1/16] %v248_v2, 128  ;;  %v360_v4 = vpop.trf.xlu1  ;;  %439 = vxpose.xlu0.b32.start [1/16] %v247_v3, 128  ;;  %v328_v5 = vpop.trf.xlu0  ;;  %v280_v2 = vld [vmem:[%s2140_s21 + $0x308] sm:$0xff]  ;;  %v279_v3 = vld [vmem:[%s2140_s21 + $0x300] sm:$0xff] }
  0xc7   : > { %635 = vst [vmem:[%s2211_s18 + $0x220] sm:$0xff] %v360_v4  ;;  %571 = vst [vmem:[%s2211_s18 + $0x20] sm:$0xff] %v328_v5 }
  0xca   : > { %472 = vxpose.xlu1.b32.cont [2/16] %v250_v6, 128  ;;  %v361_v8 = vpop.trf.xlu1  ;;  %440 = vxpose.xlu0.b32.cont [2/16] %v249_v7, 128  ;;  %v329_v9 = vpop.trf.xlu0  ;;  %v282_v6 = vld [vmem:[%s2140_s21 + $0x318] sm:$0xff]  ;;  %v281_v7 = vld [vmem:[%s2140_s21 + $0x310] sm:$0xff] }
  0xcb   : > { %639 = vst [vmem:[%s2211_s18 + $0x240] sm:$0xff] %v361_v8  ;;  %575 = vst [vmem:[%s2211_s18 + $0x40] sm:$0xff] %v329_v9 }
  0xce   : > { %473 = vxpose.xlu1.b32.cont [3/16] %v252_v10, 128  ;;  %v362_v12 = vpop.trf.xlu1  ;;  %441 = vxpose.xlu0.b32.cont [3/16] %v251_v11, 128  ;;  %v330_v13 = vpop.trf.xlu0  ;;  %v284_v10 = vld [vmem:[%s2140_s21 + $0x328] sm:$0xff]  ;;  %v283_v11 = vld [vmem:[%s2140_s21 + $0x320] sm:$0xff] }
  0xcf   : > { %643 = vst [vmem:[%s2211_s18 + $0x260] sm:$0xff] %v362_v12  ;;  %579 = vst [vmem:[%s2211_s18 + $0x60] sm:$0xff] %v330_v13 }
  0xd2   : > { %474 = vxpose.xlu1.b32.cont [4/16] %v254_v14, 128  ;;  %v363_v16 = vpop.trf.xlu1  ;;  %442 = vxpose.xlu0.b32.cont [4/16] %v253_v15, 128  ;;  %v331_v17 = vpop.trf.xlu0  ;;  %v286_v14 = vld [vmem:[%s2140_s21 + $0x338] sm:$0xff]  ;;  %v285_v15 = vld [vmem:[%s2140_s21 + $0x330] sm:$0xff] }
  0xd3   : > { %647 = vst [vmem:[%s2211_s18 + $0x280] sm:$0xff] %v363_v16  ;;  %583 = vst [vmem:[%s2211_s18 + $0x80] sm:$0xff] %v331_v17 }
  0xd6   : > { %475 = vxpose.xlu1.b32.cont [5/16] %v256_v18, 128  ;;  %v364_v20 = vpop.trf.xlu1  ;;  %443 = vxpose.xlu0.b32.cont [5/16] %v255_v19, 128  ;;  %v332_v21 = vpop.trf.xlu0  ;;  %v288_v18 = vld [vmem:[%s2140_s21 + $0x348] sm:$0xff]  ;;  %v287_v19 = vld [vmem:[%s2140_s21 + $0x340] sm:$0xff] }
  0xd7   : > { %651 = vst [vmem:[%s2211_s18 + $0x2a0] sm:$0xff] %v364_v20  ;;  %587 = vst [vmem:[%s2211_s18 + $0xa0] sm:$0xff] %v332_v21 }
  0xda   : > { %476 = vxpose.xlu1.b32.cont [6/16] %v258_v22, 128  ;;  %v365_v24 = vpop.trf.xlu1  ;;  %444 = vxpose.xlu0.b32.cont [6/16] %v257_v23, 128  ;;  %v333_v25 = vpop.trf.xlu0  ;;  %v290_v22 = vld [vmem:[%s2140_s21 + $0x358] sm:$0xff]  ;;  %v289_v23 = vld [vmem:[%s2140_s21 + $0x350] sm:$0xff] }
  0xdb   : > { %655 = vst [vmem:[%s2211_s18 + $0x2c0] sm:$0xff] %v365_v24  ;;  %591 = vst [vmem:[%s2211_s18 + $0xc0] sm:$0xff] %v333_v25 }
  0xde   : > { %477 = vxpose.xlu1.b32.cont [7/16] %v260_v26, 128  ;;  %v366_v28 = vpop.trf.xlu1  ;;  %445 = vxpose.xlu0.b32.cont [7/16] %v259_v27, 128  ;;  %v334_v29 = vpop.trf.xlu0  ;;  %v292_v26 = vld [vmem:[%s2140_s21 + $0x368] sm:$0xff]  ;;  %v291_v27 = vld [vmem:[%s2140_s21 + $0x360] sm:$0xff] }
  0xdf   : > { %659 = vst [vmem:[%s2211_s18 + $0x2e0] sm:$0xff] %v366_v28  ;;  %595 = vst [vmem:[%s2211_s18 + $0xe0] sm:$0xff] %v334_v29 }
  0xe2   : > { %478 = vxpose.xlu1.b32.cont [8/16] %v262_v30, 128  ;;  %v367_v32 = vpop.trf.xlu1  ;;  %446 = vxpose.xlu0.b32.cont [8/16] %v261_v31, 128  ;;  %v335_v33 = vpop.trf.xlu0  ;;  %v294_v30 = vld [vmem:[%s2140_s21 + $0x378] sm:$0xff]  ;;  %v293_v31 = vld [vmem:[%s2140_s21 + $0x370] sm:$0xff] }
  0xe3   : > { %663 = vst [vmem:[%s2211_s18 + $0x300] sm:$0xff] %v367_v32  ;;  %599 = vst [vmem:[%s2211_s18 + $0x100] sm:$0xff] %v335_v33 }
  0xe6   : > { %479 = vxpose.xlu1.b32.cont [9/16] %v264_v34, 128  ;;  %v368_v36 = vpop.trf.xlu1  ;;  %447 = vxpose.xlu0.b32.cont [9/16] %v263_v35, 128  ;;  %v336_v37 = vpop.trf.xlu0  ;;  %v296_v34 = vld [vmem:[%s2140_s21 + $0x388] sm:$0xff]  ;;  %v295_v35 = vld [vmem:[%s2140_s21 + $0x380] sm:$0xff] }
  0xe7   : > { %667 = vst [vmem:[%s2211_s18 + $0x320] sm:$0xff] %v368_v36  ;;  %603 = vst [vmem:[%s2211_s18 + $0x120] sm:$0xff] %v336_v37 }
  0xea   : > { %480 = vxpose.xlu1.b32.cont [10/16] %v266_v38, 128  ;;  %v369_v40 = vpop.trf.xlu1  ;;  %448 = vxpose.xlu0.b32.cont [10/16] %v265_v39, 128  ;;  %v337_v41 = vpop.trf.xlu0  ;;  %v298_v38 = vld [vmem:[%s2140_s21 + $0x398] sm:$0xff]  ;;  %v297_v39 = vld [vmem:[%s2140_s21 + $0x390] sm:$0xff] }
  0xeb   : > { %671 = vst [vmem:[%s2211_s18 + $0x340] sm:$0xff] %v369_v40  ;;  %607 = vst [vmem:[%s2211_s18 + $0x140] sm:$0xff] %v337_v41 }
  0xee   : > { %481 = vxpose.xlu1.b32.cont [11/16] %v268_v42, 128  ;;  %v370_v44 = vpop.trf.xlu1  ;;  %449 = vxpose.xlu0.b32.cont [11/16] %v267_v43, 128  ;;  %v338_v45 = vpop.trf.xlu0  ;;  %v300_v42 = vld [vmem:[%s2140_s21 + $0x3a8] sm:$0xff]  ;;  %v299_v43 = vld [vmem:[%s2140_s21 + $0x3a0] sm:$0xff] }
  0xef   : > { %675 = vst [vmem:[%s2211_s18 + $0x360] sm:$0xff] %v370_v44  ;;  %611 = vst [vmem:[%s2211_s18 + $0x160] sm:$0xff] %v338_v45 }
  0xf2   : > { %482 = vxpose.xlu1.b32.cont [12/16] %v270_v46, 128  ;;  %v371_v48 = vpop.trf.xlu1  ;;  %450 = vxpose.xlu0.b32.cont [12/16] %v269_v47, 128  ;;  %v339_v49 = vpop.trf.xlu0  ;;  %v302_v46 = vld [vmem:[%s2140_s21 + $0x3b8] sm:$0xff]  ;;  %v301_v47 = vld [vmem:[%s2140_s21 + $0x3b0] sm:$0xff] }
  0xf3   : > { %679 = vst [vmem:[%s2211_s18 + $0x380] sm:$0xff] %v371_v48  ;;  %615 = vst [vmem:[%s2211_s18 + $0x180] sm:$0xff] %v339_v49 }
  0xf6   : > { %483 = vxpose.xlu1.b32.cont [13/16] %v272_v50, 128  ;;  %v372_v52 = vpop.trf.xlu1  ;;  %451 = vxpose.xlu0.b32.cont [13/16] %v271_v51, 128  ;;  %v340_v53 = vpop.trf.xlu0  ;;  %v304_v50 = vld [vmem:[%s2140_s21 + $0x3c8] sm:$0xff]  ;;  %v303_v51 = vld [vmem:[%s2140_s21 + $0x3c0] sm:$0xff] }
  0xf7   : > { %683 = vst [vmem:[%s2211_s18 + $0x3a0] sm:$0xff] %v372_v52  ;;  %619 = vst [vmem:[%s2211_s18 + $0x1a0] sm:$0xff] %v340_v53 }
  0xfa   : > { %484 = vxpose.xlu1.b32.cont [14/16] %v274_v54, 128  ;;  %v373_v56 = vpop.trf.xlu1  ;;  %452 = vxpose.xlu0.b32.cont [14/16] %v273_v55, 128  ;;  %v341_v57 = vpop.trf.xlu0  ;;  %v306_v54 = vld [vmem:[%s2140_s21 + $0x3d8] sm:$0xff]  ;;  %v305_v55 = vld [vmem:[%s2140_s21 + $0x3d0] sm:$0xff] }
  0xfb   : > { %687 = vst [vmem:[%s2211_s18 + $0x3c0] sm:$0xff] %v373_v56  ;;  %623 = vst [vmem:[%s2211_s18 + $0x1c0] sm:$0xff] %v341_v57 }
  0xfe   : > { %485 = vxpose.xlu1.b32.cont [15/16] %v276_v58, 128  ;;  %v374_v60 = vpop.trf.xlu1  ;;  %453 = vxpose.xlu0.b32.cont [15/16] %v275_v59, 128  ;;  %v342_v61 = vpop.trf.xlu0  ;;  %v308_v58 = vld [vmem:[%s2140_s21 + $0x3e8] sm:$0xff]  ;;  %v307_v59 = vld [vmem:[%s2140_s21 + $0x3e0] sm:$0xff] }
  0xff   : > { %691 = vst [vmem:[%s2211_s18 + $0x3e0] sm:$0xff] %v374_v60  ;;  %627 = vst [vmem:[%s2211_s18 + $0x1e0] sm:$0xff] %v342_v61 }
 0x102   : > { %486 = vxpose.xlu1.b32.end [16/16] %v278_v62, 128  ;;  %v423_v0 = vpop.trf.xlu1  ;;  %454 = vxpose.xlu0.b32.end [16/16] %v277_v63, 128  ;;  %v391_v1 = vpop.trf.xlu0  ;;  %v310_v62 = vld [vmem:[%s2140_s21 + $0x3f8] sm:$0xff]  ;;  %v309_v63 = vld [vmem:[%s2140_s21 + $0x3f0] sm:$0xff] }
 0x103   : > { %632 = vst [vmem:[%s2211_s18 + $0x208] sm:$0xff] %v423_v0  ;;  %568 = vst [vmem:[%s2211_s18 + $0x8] sm:$0xff] %v391_v1 }
 0x106   : > { %535 = vxpose.xlu1.b32.start [1/16] %v280_v2, 128  ;;  %v424_v4 = vpop.trf.xlu1  ;;  %503 = vxpose.xlu0.b32.start [1/16] %v279_v3, 128  ;;  %v392_v5 = vpop.trf.xlu0 }
 0x107   : > { %636 = vst [vmem:[%s2211_s18 + $0x228] sm:$0xff] %v424_v4  ;;  %572 = vst [vmem:[%s2211_s18 + $0x28] sm:$0xff] %v392_v5 }
 0x10a   : > { %536 = vxpose.xlu1.b32.cont [2/16] %v282_v6, 128  ;;  %v425_v8 = vpop.trf.xlu1  ;;  %504 = vxpose.xlu0.b32.cont [2/16] %v281_v7, 128  ;;  %v393_v9 = vpop.trf.xlu0 }
 0x10b   : > { %640 = vst [vmem:[%s2211_s18 + $0x248] sm:$0xff] %v425_v8  ;;  %576 = vst [vmem:[%s2211_s18 + $0x48] sm:$0xff] %v393_v9 }
 0x10e   : > { %537 = vxpose.xlu1.b32.cont [3/16] %v284_v10, 128  ;;  %v426_v12 = vpop.trf.xlu1  ;;  %505 = vxpose.xlu0.b32.cont [3/16] %v283_v11, 128  ;;  %v394_v13 = vpop.trf.xlu0 }
 0x10f   : > { %644 = vst [vmem:[%s2211_s18 + $0x268] sm:$0xff] %v426_v12  ;;  %580 = vst [vmem:[%s2211_s18 + $0x68] sm:$0xff] %v394_v13 }
 0x112   : > { %538 = vxpose.xlu1.b32.cont [4/16] %v286_v14, 128  ;;  %v427_v16 = vpop.trf.xlu1  ;;  %506 = vxpose.xlu0.b32.cont [4/16] %v285_v15, 128  ;;  %v395_v17 = vpop.trf.xlu0 }
 0x113   : > { %648 = vst [vmem:[%s2211_s18 + $0x288] sm:$0xff] %v427_v16  ;;  %584 = vst [vmem:[%s2211_s18 + $0x88] sm:$0xff] %v395_v17 }
 0x116   : > { %539 = vxpose.xlu1.b32.cont [5/16] %v288_v18, 128  ;;  %v428_v20 = vpop.trf.xlu1  ;;  %507 = vxpose.xlu0.b32.cont [5/16] %v287_v19, 128  ;;  %v396_v21 = vpop.trf.xlu0 }
 0x117   : > { %652 = vst [vmem:[%s2211_s18 + $0x2a8] sm:$0xff] %v428_v20  ;;  %588 = vst [vmem:[%s2211_s18 + $0xa8] sm:$0xff] %v396_v21 }
 0x11a   : > { %540 = vxpose.xlu1.b32.cont [6/16] %v290_v22, 128  ;;  %v429_v24 = vpop.trf.xlu1  ;;  %508 = vxpose.xlu0.b32.cont [6/16] %v289_v23, 128  ;;  %v397_v25 = vpop.trf.xlu0 }
 0x11b   : > { %656 = vst [vmem:[%s2211_s18 + $0x2c8] sm:$0xff] %v429_v24  ;;  %592 = vst [vmem:[%s2211_s18 + $0xc8] sm:$0xff] %v397_v25 }
 0x11e   : > { %541 = vxpose.xlu1.b32.cont [7/16] %v292_v26, 128  ;;  %v430_v28 = vpop.trf.xlu1  ;;  %509 = vxpose.xlu0.b32.cont [7/16] %v291_v27, 128  ;;  %v398_v29 = vpop.trf.xlu0 }
 0x11f   : > { %660 = vst [vmem:[%s2211_s18 + $0x2e8] sm:$0xff] %v430_v28  ;;  %596 = vst [vmem:[%s2211_s18 + $0xe8] sm:$0xff] %v398_v29 }
 0x122   : > { %542 = vxpose.xlu1.b32.cont [8/16] %v294_v30, 128  ;;  %v431_v32 = vpop.trf.xlu1  ;;  %510 = vxpose.xlu0.b32.cont [8/16] %v293_v31, 128  ;;  %v399_v33 = vpop.trf.xlu0 }
 0x123   : > { %664 = vst [vmem:[%s2211_s18 + $0x308] sm:$0xff] %v431_v32  ;;  %600 = vst [vmem:[%s2211_s18 + $0x108] sm:$0xff] %v399_v33 }
 0x126   : > { %543 = vxpose.xlu1.b32.cont [9/16] %v296_v34, 128  ;;  %v432_v36 = vpop.trf.xlu1  ;;  %511 = vxpose.xlu0.b32.cont [9/16] %v295_v35, 128  ;;  %v400_v37 = vpop.trf.xlu0 }
 0x127   : > { %668 = vst [vmem:[%s2211_s18 + $0x328] sm:$0xff] %v432_v36  ;;  %604 = vst [vmem:[%s2211_s18 + $0x128] sm:$0xff] %v400_v37 }
 0x12a   : > { %544 = vxpose.xlu1.b32.cont [10/16] %v298_v38, 128  ;;  %v433_v40 = vpop.trf.xlu1  ;;  %512 = vxpose.xlu0.b32.cont [10/16] %v297_v39, 128  ;;  %v401_v41 = vpop.trf.xlu0 }
 0x12b   : > { %672 = vst [vmem:[%s2211_s18 + $0x348] sm:$0xff] %v433_v40  ;;  %608 = vst [vmem:[%s2211_s18 + $0x148] sm:$0xff] %v401_v41 }
 0x12e   : > { %545 = vxpose.xlu1.b32.cont [11/16] %v300_v42, 128  ;;  %v434_v44 = vpop.trf.xlu1  ;;  %513 = vxpose.xlu0.b32.cont [11/16] %v299_v43, 128  ;;  %v402_v45 = vpop.trf.xlu0 }
 0x12f   : > { %676 = vst [vmem:[%s2211_s18 + $0x368] sm:$0xff] %v434_v44  ;;  %612 = vst [vmem:[%s2211_s18 + $0x168] sm:$0xff] %v402_v45 }
 0x132   : > { %546 = vxpose.xlu1.b32.cont [12/16] %v302_v46, 128  ;;  %v435_v48 = vpop.trf.xlu1  ;;  %514 = vxpose.xlu0.b32.cont [12/16] %v301_v47, 128  ;;  %v403_v49 = vpop.trf.xlu0 }
 0x133   : > { %680 = vst [vmem:[%s2211_s18 + $0x388] sm:$0xff] %v435_v48  ;;  %616 = vst [vmem:[%s2211_s18 + $0x188] sm:$0xff] %v403_v49 }
 0x136   : > { %547 = vxpose.xlu1.b32.cont [13/16] %v304_v50, 128  ;;  %v436_v52 = vpop.trf.xlu1  ;;  %515 = vxpose.xlu0.b32.cont [13/16] %v303_v51, 128  ;;  %v404_v53 = vpop.trf.xlu0 }
 0x137   : > { %684 = vst [vmem:[%s2211_s18 + $0x3a8] sm:$0xff] %v436_v52  ;;  %620 = vst [vmem:[%s2211_s18 + $0x1a8] sm:$0xff] %v404_v53 }
 0x13a   : > { %548 = vxpose.xlu1.b32.cont [14/16] %v306_v54, 128  ;;  %v437_v56 = vpop.trf.xlu1  ;;  %516 = vxpose.xlu0.b32.cont [14/16] %v305_v55, 128  ;;  %v405_v57 = vpop.trf.xlu0 }
 0x13b   : > { %688 = vst [vmem:[%s2211_s18 + $0x3c8] sm:$0xff] %v437_v56  ;;  %624 = vst [vmem:[%s2211_s18 + $0x1c8] sm:$0xff] %v405_v57 }
 0x13e   : > { %549 = vxpose.xlu1.b32.cont [15/16] %v308_v58, 128  ;;  %v438_v60 = vpop.trf.xlu1  ;;  %517 = vxpose.xlu0.b32.cont [15/16] %v307_v59, 128  ;;  %v406_v61 = vpop.trf.xlu0 }
 0x13f   : > { %692 = vst [vmem:[%s2211_s18 + $0x3e8] sm:$0xff] %v438_v60  ;;  %628 = vst [vmem:[%s2211_s18 + $0x1e8] sm:$0xff] %v406_v61 }
 0x142   : > { %550 = vxpose.xlu1.b32.end [16/16] %v310_v62, 128  ;;  %v487_v0 = vpop.trf.xlu1  ;;  %518 = vxpose.xlu0.b32.end [16/16] %v309_v63, 128  ;;  %v455_v1 = vpop.trf.xlu0 }
 0x143   : > { %633 = vst [vmem:[%s2211_s18 + $0x210] sm:$0xff] %v487_v0  ;;  %569 = vst [vmem:[%s2211_s18 + $0x10] sm:$0xff] %v455_v1 }
 0x146   : > { %v488_v2 = vpop.trf.xlu1  ;;  %v456_v3 = vpop.trf.xlu0 }
 0x147   : > { %637 = vst [vmem:[%s2211_s18 + $0x230] sm:$0xff] %v488_v2  ;;  %573 = vst [vmem:[%s2211_s18 + $0x30] sm:$0xff] %v456_v3 }
 0x14a   : > { %v489_v4 = vpop.trf.xlu1  ;;  %v457_v5 = vpop.trf.xlu0 }
 0x14b   : > { %641 = vst [vmem:[%s2211_s18 + $0x250] sm:$0xff] %v489_v4  ;;  %577 = vst [vmem:[%s2211_s18 + $0x50] sm:$0xff] %v457_v5 }
 0x14e   : > { %v490_v6 = vpop.trf.xlu1  ;;  %v458_v7 = vpop.trf.xlu0 }
 0x14f   : > { %645 = vst [vmem:[%s2211_s18 + $0x270] sm:$0xff] %v490_v6  ;;  %581 = vst [vmem:[%s2211_s18 + $0x70] sm:$0xff] %v458_v7 }
 0x152   : > { %v491_v8 = vpop.trf.xlu1  ;;  %v459_v9 = vpop.trf.xlu0 }
 0x153   : > { %649 = vst [vmem:[%s2211_s18 + $0x290] sm:$0xff] %v491_v8  ;;  %585 = vst [vmem:[%s2211_s18 + $0x90] sm:$0xff] %v459_v9 }
 0x156   : > { %v492_v10 = vpop.trf.xlu1  ;;  %v460_v11 = vpop.trf.xlu0 }
 0x157   : > { %653 = vst [vmem:[%s2211_s18 + $0x2b0] sm:$0xff] %v492_v10  ;;  %589 = vst [vmem:[%s2211_s18 + $0xb0] sm:$0xff] %v460_v11 }
 0x15a   : > { %v493_v12 = vpop.trf.xlu1  ;;  %v461_v13 = vpop.trf.xlu0 }
 0x15b   : > { %657 = vst [vmem:[%s2211_s18 + $0x2d0] sm:$0xff] %v493_v12  ;;  %593 = vst [vmem:[%s2211_s18 + $0xd0] sm:$0xff] %v461_v13 }
 0x15e   : > { %v494_v14 = vpop.trf.xlu1  ;;  %v462_v15 = vpop.trf.xlu0 }
 0x15f   : > { %661 = vst [vmem:[%s2211_s18 + $0x2f0] sm:$0xff] %v494_v14  ;;  %597 = vst [vmem:[%s2211_s18 + $0xf0] sm:$0xff] %v462_v15 }
 0x162   : > { %v495_v16 = vpop.trf.xlu1  ;;  %v463_v17 = vpop.trf.xlu0 }
 0x163   : > { %665 = vst [vmem:[%s2211_s18 + $0x310] sm:$0xff] %v495_v16  ;;  %601 = vst [vmem:[%s2211_s18 + $0x110] sm:$0xff] %v463_v17 }
 0x166   : > { %v496_v18 = vpop.trf.xlu1  ;;  %v464_v19 = vpop.trf.xlu0 }
 0x167   : > { %669 = vst [vmem:[%s2211_s18 + $0x330] sm:$0xff] %v496_v18  ;;  %605 = vst [vmem:[%s2211_s18 + $0x130] sm:$0xff] %v464_v19 }
 0x16a   : > { %v497_v20 = vpop.trf.xlu1  ;;  %v465_v21 = vpop.trf.xlu0 }
 0x16b   : > { %673 = vst [vmem:[%s2211_s18 + $0x350] sm:$0xff] %v497_v20  ;;  %609 = vst [vmem:[%s2211_s18 + $0x150] sm:$0xff] %v465_v21 }
 0x16e   : > { %v498_v22 = vpop.trf.xlu1  ;;  %v466_v23 = vpop.trf.xlu0 }
 0x16f   : > { %677 = vst [vmem:[%s2211_s18 + $0x370] sm:$0xff] %v498_v22  ;;  %613 = vst [vmem:[%s2211_s18 + $0x170] sm:$0xff] %v466_v23 }
 0x172   : > { %v499_v24 = vpop.trf.xlu1  ;;  %v467_v25 = vpop.trf.xlu0 }
 0x173   : > { %681 = vst [vmem:[%s2211_s18 + $0x390] sm:$0xff] %v499_v24  ;;  %617 = vst [vmem:[%s2211_s18 + $0x190] sm:$0xff] %v467_v25 }
 0x176   : > { %v500_v26 = vpop.trf.xlu1  ;;  %v468_v27 = vpop.trf.xlu0 }
 0x177   : > { %685 = vst [vmem:[%s2211_s18 + $0x3b0] sm:$0xff] %v500_v26  ;;  %621 = vst [vmem:[%s2211_s18 + $0x1b0] sm:$0xff] %v468_v27 }
 0x17a   : > { %v501_v28 = vpop.trf.xlu1  ;;  %v469_v29 = vpop.trf.xlu0 }
 0x17b   : > { %689 = vst [vmem:[%s2211_s18 + $0x3d0] sm:$0xff] %v501_v28  ;;  %625 = vst [vmem:[%s2211_s18 + $0x1d0] sm:$0xff] %v469_v29 }
 0x17e   : > { %v502_v30 = vpop.trf.xlu1  ;;  %v470_v31 = vpop.trf.xlu0 }
 0x17f   : > { %693 = vst [vmem:[%s2211_s18 + $0x3f0] sm:$0xff] %v502_v30  ;;  %629 = vst [vmem:[%s2211_s18 + $0x1f0] sm:$0xff] %v470_v31 }
 0x182   : > { %v551_v32 = vpop.trf.xlu1  ;;  %v519_v33 = vpop.trf.xlu0 }
 0x183   : > { %634 = vst [vmem:[%s2211_s18 + $0x218] sm:$0xff] %v551_v32  ;;  %570 = vst [vmem:[%s2211_s18 + $0x18] sm:$0xff] %v519_v33 }
 0x186   : > { %v552_v34 = vpop.trf.xlu1  ;;  %v520_v35 = vpop.trf.xlu0 }
 0x187   : > { %638 = vst [vmem:[%s2211_s18 + $0x238] sm:$0xff] %v552_v34  ;;  %574 = vst [vmem:[%s2211_s18 + $0x38] sm:$0xff] %v520_v35 }
 0x18a   : > { %v553_v36 = vpop.trf.xlu1  ;;  %v521_v37 = vpop.trf.xlu0 }
 0x18b   : > { %642 = vst [vmem:[%s2211_s18 + $0x258] sm:$0xff] %v553_v36  ;;  %578 = vst [vmem:[%s2211_s18 + $0x58] sm:$0xff] %v521_v37 }
 0x18e   : > { %v554_v38 = vpop.trf.xlu1  ;;  %v522_v39 = vpop.trf.xlu0 }
 0x18f   : > { %646 = vst [vmem:[%s2211_s18 + $0x278] sm:$0xff] %v554_v38  ;;  %582 = vst [vmem:[%s2211_s18 + $0x78] sm:$0xff] %v522_v39 }
 0x192   : > { %v555_v40 = vpop.trf.xlu1  ;;  %v523_v41 = vpop.trf.xlu0 }
 0x193   : > { %650 = vst [vmem:[%s2211_s18 + $0x298] sm:$0xff] %v555_v40  ;;  %586 = vst [vmem:[%s2211_s18 + $0x98] sm:$0xff] %v523_v41 }
 0x196   : > { %v556_v42 = vpop.trf.xlu1  ;;  %v524_v43 = vpop.trf.xlu0 }
 0x197   : > { %654 = vst [vmem:[%s2211_s18 + $0x2b8] sm:$0xff] %v556_v42  ;;  %590 = vst [vmem:[%s2211_s18 + $0xb8] sm:$0xff] %v524_v43 }
 0x19a   : > { %v557_v44 = vpop.trf.xlu1  ;;  %v525_v45 = vpop.trf.xlu0 }
 0x19b   : > { %658 = vst [vmem:[%s2211_s18 + $0x2d8] sm:$0xff] %v557_v44  ;;  %594 = vst [vmem:[%s2211_s18 + $0xd8] sm:$0xff] %v525_v45 }
 0x19e   : > { %v558_v46 = vpop.trf.xlu1  ;;  %v526_v47 = vpop.trf.xlu0 }
 0x19f   : > { %662 = vst [vmem:[%s2211_s18 + $0x2f8] sm:$0xff] %v558_v46  ;;  %598 = vst [vmem:[%s2211_s18 + $0xf8] sm:$0xff] %v526_v47 }
 0x1a2   : > { %v559_v48 = vpop.trf.xlu1  ;;  %v527_v49 = vpop.trf.xlu0 }
 0x1a3   : > { %666 = vst [vmem:[%s2211_s18 + $0x318] sm:$0xff] %v559_v48  ;;  %602 = vst [vmem:[%s2211_s18 + $0x118] sm:$0xff] %v527_v49 }
 0x1a6   : > { %v560_v50 = vpop.trf.xlu1  ;;  %v528_v51 = vpop.trf.xlu0 }
 0x1a7   : > { %670 = vst [vmem:[%s2211_s18 + $0x338] sm:$0xff] %v560_v50  ;;  %606 = vst [vmem:[%s2211_s18 + $0x138] sm:$0xff] %v528_v51 }
 0x1aa   : > { %v561_v52 = vpop.trf.xlu1  ;;  %v529_v53 = vpop.trf.xlu0 }
 0x1ab   : > { %674 = vst [vmem:[%s2211_s18 + $0x358] sm:$0xff] %v561_v52  ;;  %610 = vst [vmem:[%s2211_s18 + $0x158] sm:$0xff] %v529_v53 }
 0x1ae   : > { %v562_v54 = vpop.trf.xlu1  ;;  %v530_v55 = vpop.trf.xlu0 }
 0x1af   : > { %678 = vst [vmem:[%s2211_s18 + $0x378] sm:$0xff] %v562_v54  ;;  %614 = vst [vmem:[%s2211_s18 + $0x178] sm:$0xff] %v530_v55 }
 0x1b2   : > { %v563_v56 = vpop.trf.xlu1  ;;  %v531_v57 = vpop.trf.xlu0 }
 0x1b3   : > { %682 = vst [vmem:[%s2211_s18 + $0x398] sm:$0xff] %v563_v56  ;;  %618 = vst [vmem:[%s2211_s18 + $0x198] sm:$0xff] %v531_v57 }
 0x1b6   : > { %v564_v58 = vpop.trf.xlu1  ;;  %v532_v59 = vpop.trf.xlu0 }
 0x1b7   : > { %686 = vst [vmem:[%s2211_s18 + $0x3b8] sm:$0xff] %v564_v58  ;;  %622 = vst [vmem:[%s2211_s18 + $0x1b8] sm:$0xff] %v532_v59 }
 0x1ba   : > { %v565_v60 = vpop.trf.xlu1  ;;  %v533_v61 = vpop.trf.xlu0 }
 0x1bb   : > { %690 = vst [vmem:[%s2211_s18 + $0x3d8] sm:$0xff] %v565_v60  ;;  %626 = vst [vmem:[%s2211_s18 + $0x1d8] sm:$0xff] %v533_v61  ;;  %701 = sbr.rel (!%p2088_p9) target bundleno = 706 (0x2c2), region = 32 }
 0x1be   : > { %v566_v62 = vpop.trf.xlu1  ;;  %v534_v63 = vpop.trf.xlu0 }
 0x1bf   : > { %694 = vst [vmem:[%s2211_s18 + $0x3f8] sm:$0xff] %v566_v62  ;;  %630 = vst [vmem:[%s2211_s18 + $0x1f8] sm:$0xff] %v534_v63 }
 0x1c0   : > { %s3345_s5 = smov (!%p705_p7, %s704_s5), 4 }
 0x1c1   : > { %s1552_s29 = sshll.u32 %s3345_s5, 12  ;;  %s2414_s2 = sshll.u32 %s3345_s5, 3 }
 0x1c2   : > { %p1556_p13 = scmp.eq.s32.totalorder %s1552_s29, 0 }
 0x1c3   : > { %p719_p9 = scmp.lt.u32.totalorder (!%p1556_p13), %s2414_s2, 8 }
 0x1c4   : > { %718 = sbr.rel (%p1556_p13) target bundleno = 706 (0x2c2), region = 36 }
 0x1c9   : > { %722 = sbr.rel (%p719_p9) target bundleno = 666 (0x29a), region = 40  ;;  %s2418_s9 = sand.u32 (!%p719_p9), 7, %s2414_s2  }
 0x1ca   : > { %p801_p4 = scmp.eq.s32.totalorder (!%p719_p9), %s2418_s9, 0  ;;  %p1557_p5 = scmp.ne.s32.totalorder (!%p719_p9), %s2418_s9, 0 }
 0x1ce   : > { %804 = sbr.rel (%p1557_p5) target bundleno = 546 (0x222), region = 55  ;;  %s805_s10 = sshrl.u32 (!%p1557_p5), %s2414_s2, 3 }
 0x1cf   : > { %s2425_s22 = sshrl.u32 (!%p1557_p5), %s805_s10, 1 }
 0x1d0   : > { %p1558_p6 = scmp.le.s32.totalorder (!%p1557_p5), %s2425_s22, 0 }
 0x1d3   : > { %1445 = sbr.rel (%p1558_p6) target bundleno = 505 (0x1f9), region = 142  ;;  %s3309_s3 = smov (!%p1558_p6), %s2412_s27 }
 0x1d4   : > { %s3310_s4 = smov (!%p1558_p6), %s2211_s18  ;;  %s2434_s6 = smov (!%p1558_p6), 0  }
 0x1d5   : > { %s2436_s16 = smov (!%p1558_p6), 0  }
 0x1d8 LB: >> { %v818_v0 = vld [vmem:[%s1950_s4] sm:$0xff]  ;;  %v820_v1 = vld [vmem:[%s1950_s4 + $0x8] sm:$0xff]  ;;  %s946_s17 = sadd.s32 1, %s1954_s6  ;;  %s812_s16 = sadd.s32 1, %s1958_s16   ;;  %s1958_s16 = sphi %s2436_s16, %s812_s16   ;;  %s1954_s6 = sphi %s2434_s6, %s3313_s6   ;;  %s1950_s4 = sphi %s3310_s4, %s3312_s4   ;;  %s1946_s3 = sphi %s3309_s3, %s3311_s3  }
 0x1d9   : >> { %v822_v2 = vld [vmem:[%s1950_s4 + $0x20] sm:$0xff]  ;;  %819 = vst [vmem:[%s1946_s3] sm:$0xff] %v818_v0  ;;  %821 = vst [vmem:[%s1946_s3 + $0x8] sm:$0xff] %v820_v1  ;;  %v824_v3 = vld [vmem:[%s1950_s4 + $0x28] sm:$0xff]  ;;  %p947_p8 = scmp.ge.s32.totalorder %s946_s17, %s2425_s22  ;;  %p811_p10 = scmp.ge.s32.totalorder %s812_s16, %s2425_s22 }
 0x1da   : >> { %823 = vst [vmem:[%s1946_s3 + $0x28] sm:$0xff] %v822_v2  ;;  %v826_v4 = vld [vmem:[%s1950_s4 + $0x40] sm:$0xff]  ;;  %v828_v5 = vld [vmem:[%s1950_s4 + $0x48] sm:$0xff]  ;;  %825 = vst [vmem:[%s1946_s3 + $0x30] sm:$0xff] %v824_v3 }
 0x1db   : >> { %827 = vst [vmem:[%s1946_s3 + $0x50] sm:$0xff] %v826_v4  ;;  %829 = vst [vmem:[%s1946_s3 + $0x58] sm:$0xff] %v828_v5  ;;  %v830_v6 = vld [vmem:[%s1950_s4 + $0x60] sm:$0xff]  ;;  %v832_v7 = vld [vmem:[%s1950_s4 + $0x68] sm:$0xff]  ;;  %s3347_s17 = smov (%p947_p8, %s946_s17), 0 }
 0x1dc   : >> { %v834_v8 = vld [vmem:[%s1950_s4 + $0x80] sm:$0xff]  ;;  %831 = vst [vmem:[%s1946_s3 + $0x78] sm:$0xff] %v830_v6  ;;  %833 = vst [vmem:[%s1946_s3 + $0x80] sm:$0xff] %v832_v7  ;;  %v836_v9 = vld [vmem:[%s1950_s4 + $0x88] sm:$0xff]  ;;  %s1559_s19 = sshll.u32 %s3347_s17, 4  ;;  %s3313_s6 = smov %s3347_s17 }
 0x1dd   : >> { %835 = vst [vmem:[%s1946_s3 + $0xa0] sm:$0xff] %v834_v8  ;;  %v838_v10 = vld [vmem:[%s1950_s4 + $0xa0] sm:$0xff]  ;;  %v840_v11 = vld [vmem:[%s1950_s4 + $0xa8] sm:$0xff]  ;;  %837 = vst [vmem:[%s1946_s3 + $0xa8] sm:$0xff] %v836_v9  ;;  %s2492_s21 = scalar_lea.vmem %s2211_s18, %s1559_s19 [#allocation4]   ;;  %s2495_s28 = scalar_lea.vmem %s2412_s27, %s1559_s19  }
 0x1de   : >> { %839 = vst [vmem:[%s1946_s3 + $0xc8] sm:$0xff] %v838_v10  ;;  %841 = vst [vmem:[%s1946_s3 + $0xd0] sm:$0xff] %v840_v11  ;;  %v842_v12 = vld [vmem:[%s1950_s4 + $0xc0] sm:$0xff]  ;;  %v844_v13 = vld [vmem:[%s1950_s4 + $0xc8] sm:$0xff] }
 0x1df   : >> { %v846_v14 = vld [vmem:[%s1950_s4 + $0xe0] sm:$0xff]  ;;  %843 = vst [vmem:[%s1946_s3 + $0xf0] sm:$0xff] %v842_v12  ;;  %845 = vst [vmem:[%s1946_s3 + $0xf8] sm:$0xff] %v844_v13  ;;  %v848_v15 = vld [vmem:[%s1950_s4 + $0xe8] sm:$0xff] }
 0x1e0   : >> { %847 = vst [vmem:[%s1946_s3 + $0x118] sm:$0xff] %v846_v14  ;;  %v850_v16 = vld [vmem:[%s1950_s4 + $0x100] sm:$0xff]  ;;  %v852_v17 = vld [vmem:[%s1950_s4 + $0x108] sm:$0xff]  ;;  %849 = vst [vmem:[%s1946_s3 + $0x120] sm:$0xff] %v848_v15 }
 0x1e1   : >> { %851 = vst [vmem:[%s1946_s3 + $0x140] sm:$0xff] %v850_v16  ;;  %853 = vst [vmem:[%s1946_s3 + $0x148] sm:$0xff] %v852_v17  ;;  %v854_v18 = vld [vmem:[%s1950_s4 + $0x120] sm:$0xff]  ;;  %v856_v19 = vld [vmem:[%s1950_s4 + $0x128] sm:$0xff] }
 0x1e2   : >> { %v858_v20 = vld [vmem:[%s1950_s4 + $0x140] sm:$0xff]  ;;  %855 = vst [vmem:[%s1946_s3 + $0x168] sm:$0xff] %v854_v18  ;;  %857 = vst [vmem:[%s1946_s3 + $0x170] sm:$0xff] %v856_v19  ;;  %v860_v21 = vld [vmem:[%s1950_s4 + $0x148] sm:$0xff] }
 0x1e3   : >> { %859 = vst [vmem:[%s1946_s3 + $0x190] sm:$0xff] %v858_v20  ;;  %v862_v22 = vld [vmem:[%s1950_s4 + $0x160] sm:$0xff]  ;;  %v864_v23 = vld [vmem:[%s1950_s4 + $0x168] sm:$0xff]  ;;  %861 = vst [vmem:[%s1946_s3 + $0x198] sm:$0xff] %v860_v21 }
 0x1e4   : >> { %863 = vst [vmem:[%s1946_s3 + $0x1b8] sm:$0xff] %v862_v22  ;;  %865 = vst [vmem:[%s1946_s3 + $0x1c0] sm:$0xff] %v864_v23  ;;  %v866_v24 = vld [vmem:[%s1950_s4 + $0x180] sm:$0xff]  ;;  %v868_v25 = vld [vmem:[%s1950_s4 + $0x188] sm:$0xff] }
 0x1e5   : >> { %v870_v26 = vld [vmem:[%s1950_s4 + $0x1a0] sm:$0xff]  ;;  %867 = vst [vmem:[%s1946_s3 + $0x1e0] sm:$0xff] %v866_v24  ;;  %869 = vst [vmem:[%s1946_s3 + $0x1e8] sm:$0xff] %v868_v25  ;;  %v872_v27 = vld [vmem:[%s1950_s4 + $0x1a8] sm:$0xff] }
 0x1e6   : >> { %871 = vst [vmem:[%s1946_s3 + $0x208] sm:$0xff] %v870_v26  ;;  %v874_v28 = vld [vmem:[%s1950_s4 + $0x1c0] sm:$0xff]  ;;  %v876_v29 = vld [vmem:[%s1950_s4 + $0x1c8] sm:$0xff]  ;;  %873 = vst [vmem:[%s1946_s3 + $0x210] sm:$0xff] %v872_v27 }
 0x1e7   : >> { %875 = vst [vmem:[%s1946_s3 + $0x230] sm:$0xff] %v874_v28  ;;  %877 = vst [vmem:[%s1946_s3 + $0x238] sm:$0xff] %v876_v29  ;;  %v878_v30 = vld [vmem:[%s1950_s4 + $0x1e0] sm:$0xff]  ;;  %v880_v31 = vld [vmem:[%s1950_s4 + $0x1e8] sm:$0xff] }
 0x1e8   : >> { %v882_v32 = vld [vmem:[%s1950_s4 + $0x200] sm:$0xff]  ;;  %879 = vst [vmem:[%s1946_s3 + $0x258] sm:$0xff] %v878_v30  ;;  %881 = vst [vmem:[%s1946_s3 + $0x260] sm:$0xff] %v880_v31  ;;  %v884_v33 = vld [vmem:[%s1950_s4 + $0x208] sm:$0xff] }
 0x1e9   : >> { %883 = vst [vmem:[%s1946_s3 + $0x280] sm:$0xff] %v882_v32  ;;  %v886_v34 = vld [vmem:[%s1950_s4 + $0x220] sm:$0xff]  ;;  %v888_v35 = vld [vmem:[%s1950_s4 + $0x228] sm:$0xff]  ;;  %885 = vst [vmem:[%s1946_s3 + $0x288] sm:$0xff] %v884_v33 }
 0x1ea   : >> { %887 = vst [vmem:[%s1946_s3 + $0x2a8] sm:$0xff] %v886_v34  ;;  %889 = vst [vmem:[%s1946_s3 + $0x2b0] sm:$0xff] %v888_v35  ;;  %v890_v36 = vld [vmem:[%s1950_s4 + $0x240] sm:$0xff]  ;;  %v892_v37 = vld [vmem:[%s1950_s4 + $0x248] sm:$0xff] }
 0x1eb   : >> { %v894_v38 = vld [vmem:[%s1950_s4 + $0x260] sm:$0xff]  ;;  %891 = vst [vmem:[%s1946_s3 + $0x2d0] sm:$0xff] %v890_v36  ;;  %893 = vst [vmem:[%s1946_s3 + $0x2d8] sm:$0xff] %v892_v37  ;;  %v896_v39 = vld [vmem:[%s1950_s4 + $0x268] sm:$0xff] }
 0x1ec   : >> { %895 = vst [vmem:[%s1946_s3 + $0x2f8] sm:$0xff] %v894_v38  ;;  %v898_v40 = vld [vmem:[%s1950_s4 + $0x280] sm:$0xff]  ;;  %v900_v41 = vld [vmem:[%s1950_s4 + $0x288] sm:$0xff]  ;;  %897 = vst [vmem:[%s1946_s3 + $0x300] sm:$0xff] %v896_v39 }
 0x1ed   : >> { %899 = vst [vmem:[%s1946_s3 + $0x320] sm:$0xff] %v898_v40  ;;  %901 = vst [vmem:[%s1946_s3 + $0x328] sm:$0xff] %v900_v41  ;;  %v902_v42 = vld [vmem:[%s1950_s4 + $0x2a0] sm:$0xff]  ;;  %v904_v43 = vld [vmem:[%s1950_s4 + $0x2a8] sm:$0xff] }
 0x1ee   : >> { %v906_v44 = vld [vmem:[%s1950_s4 + $0x2c0] sm:$0xff]  ;;  %903 = vst [vmem:[%s1946_s3 + $0x348] sm:$0xff] %v902_v42  ;;  %905 = vst [vmem:[%s1946_s3 + $0x350] sm:$0xff] %v904_v43  ;;  %v908_v45 = vld [vmem:[%s1950_s4 + $0x2c8] sm:$0xff] }
 0x1ef   : >> { %907 = vst [vmem:[%s1946_s3 + $0x370] sm:$0xff] %v906_v44  ;;  %v910_v46 = vld [vmem:[%s1950_s4 + $0x2e0] sm:$0xff]  ;;  %v912_v47 = vld [vmem:[%s1950_s4 + $0x2e8] sm:$0xff]  ;;  %909 = vst [vmem:[%s1946_s3 + $0x378] sm:$0xff] %v908_v45 }
 0x1f0   : >> { %911 = vst [vmem:[%s1946_s3 + $0x398] sm:$0xff] %v910_v46  ;;  %913 = vst [vmem:[%s1946_s3 + $0x3a0] sm:$0xff] %v912_v47  ;;  %v914_v48 = vld [vmem:[%s1950_s4 + $0x300] sm:$0xff]  ;;  %v916_v49 = vld [vmem:[%s1950_s4 + $0x308] sm:$0xff] }
 0x1f1   : >> { %v918_v50 = vld [vmem:[%s1950_s4 + $0x320] sm:$0xff]  ;;  %915 = vst [vmem:[%s1946_s3 + $0x3c0] sm:$0xff] %v914_v48  ;;  %917 = vst [vmem:[%s1946_s3 + $0x3c8] sm:$0xff] %v916_v49  ;;  %v920_v51 = vld [vmem:[%s1950_s4 + $0x328] sm:$0xff] }
 0x1f2   : >> { %919 = vst [vmem:[%s1946_s3 + $0x3e8] sm:$0xff] %v918_v50  ;;  %v922_v52 = vld [vmem:[%s1950_s4 + $0x340] sm:$0xff]  ;;  %v924_v53 = vld [vmem:[%s1950_s4 + $0x348] sm:$0xff]  ;;  %921 = vst [vmem:[%s1946_s3 + $0x3f0] sm:$0xff] %v920_v51 }
 0x1f3   : >> { %923 = vst [vmem:[%s1946_s3 + $0x410] sm:$0xff] %v922_v52  ;;  %925 = vst [vmem:[%s1946_s3 + $0x418] sm:$0xff] %v924_v53  ;;  %v926_v54 = vld [vmem:[%s1950_s4 + $0x360] sm:$0xff]  ;;  %v928_v55 = vld [vmem:[%s1950_s4 + $0x368] sm:$0xff] }
 0x1f4   : >> { %v930_v56 = vld [vmem:[%s1950_s4 + $0x380] sm:$0xff]  ;;  %927 = vst [vmem:[%s1946_s3 + $0x438] sm:$0xff] %v926_v54  ;;  %929 = vst [vmem:[%s1946_s3 + $0x440] sm:$0xff] %v928_v55  ;;  %v932_v57 = vld [vmem:[%s1950_s4 + $0x388] sm:$0xff]  ;;  %814 = sbr.rel (!%p811_p10) target bundleno = 472 (0x1d8), region = 148 }
 0x1f5   : >> { %931 = vst [vmem:[%s1946_s3 + $0x460] sm:$0xff] %v930_v56  ;;  %v934_v58 = vld [vmem:[%s1950_s4 + $0x3a0] sm:$0xff]  ;;  %v936_v59 = vld [vmem:[%s1950_s4 + $0x3a8] sm:$0xff]  ;;  %933 = vst [vmem:[%s1946_s3 + $0x468] sm:$0xff] %v932_v57 }
 0x1f6   : >> { %935 = vst [vmem:[%s1946_s3 + $0x488] sm:$0xff] %v934_v58  ;;  %937 = vst [vmem:[%s1946_s3 + $0x490] sm:$0xff] %v936_v59  ;;  %v938_v60 = vld [vmem:[%s1950_s4 + $0x3c0] sm:$0xff]  ;;  %v940_v61 = vld [vmem:[%s1950_s4 + $0x3c8] sm:$0xff] }
 0x1f7   : >> { %v942_v62 = vld [vmem:[%s1950_s4 + $0x3e0] sm:$0xff]  ;;  %939 = vst [vmem:[%s1946_s3 + $0x4b0] sm:$0xff] %v938_v60  ;;  %941 = vst [vmem:[%s1946_s3 + $0x4b8] sm:$0xff] %v940_v61  ;;  %v944_v63 = vld [vmem:[%s1950_s4 + $0x3e8] sm:$0xff]  ;;  %s3312_s4 = smov %s2492_s21 }
 0x1f8   : >> { %943 = vst [vmem:[%s1946_s3 + $0x4d8] sm:$0xff] %v942_v62  ;;  %945 = vst [vmem:[%s1946_s3 + $0x4e0] sm:$0xff] %v944_v63  ;;  %s3311_s3 = smov %s2495_s28 }
 0x1f9 PF: > { %s2601_s30 = sand.u32 1, %s805_s10   ;;  %s1583_s5 = sshll.u32 %s2425_s22, 8 }
 0x1fa   : > { %s957_s20 = sshra.s32 %s1583_s5, 4  ;;  %p1564_p11 = scmp.le.s32.totalorder %s2601_s30, 0 }
 0x1fb   : > { %s2605_s24 = scalar_lea.vmem %s2211_s18, %s957_s20 [#allocation4]   ;;  %s2608_s25 = scalar_lea.vmem %s2412_s27, %s957_s20  }
 0x1fc   : > { %1459 = sbr.rel (%p1564_p11) target bundleno = 546 (0x222), region = 153  ;;  %s3314_s26 = smov (!%p1564_p11), %s2608_s25 }
 0x1fd   : > { %s3315_s29 = smov (!%p1564_p11), %s2605_s24  ;;  %s2617_s3 = smov (!%p1564_p11), 0  }
 0x1fe   : > { %s2619_s4 = smov (!%p1564_p11), 0  }
 0x201 LB: >> { %v973_v0 = vld [vmem:[%s1966_s29] sm:$0xff]  ;;  %s1037_s10 = sadd.s32 1, %s1970_s3  ;;  %s967_s4 = sadd.s32 1, %s1974_s4   ;;  %s1974_s4 = sphi %s2619_s4, %s967_s4   ;;  %s1970_s3 = sphi %s2617_s3, %s3318_s3   ;;  %s1966_s29 = sphi %s3315_s29, %s3317_s29   ;;  %s1962_s26 = sphi %s3314_s26, %s3316_s26  }
 0x202   : >> { %v975_v1 = vld [vmem:[%s1966_s29 + $0x20] sm:$0xff]  ;;  %974 = vst [vmem:[%s1962_s26] sm:$0xff] %v973_v0  ;;  %p1038_p12 = scmp.ge.s32.totalorder %s1037_s10, %s2601_s30  ;;  %p966_p0 = scmp.ge.s32.totalorder %s967_s4, %s2601_s30 }
 0x203   : >> { %v977_v2 = vld [vmem:[%s1966_s29 + $0x40] sm:$0xff]  ;;  %976 = vst [vmem:[%s1962_s26 + $0x28] sm:$0xff] %v975_v1 }
 0x204   : >> { %978 = vst [vmem:[%s1962_s26 + $0x50] sm:$0xff] %v977_v2  ;;  %v979_v3 = vld [vmem:[%s1966_s29 + $0x60] sm:$0xff]  ;;  %s3349_s10 = smov (%p1038_p12, %s1037_s10), 0 }
 0x205   : >> { %v981_v4 = vld [vmem:[%s1966_s29 + $0x80] sm:$0xff]  ;;  %980 = vst [vmem:[%s1962_s26 + $0x78] sm:$0xff] %v979_v3  ;;  %s1565_s22 = sshll.u32 %s3349_s10, 3  ;;  %s3318_s3 = smov %s3349_s10 }
 0x206   : >> { %v983_v5 = vld [vmem:[%s1966_s29 + $0xa0] sm:$0xff]  ;;  %982 = vst [vmem:[%s1962_s26 + $0xa0] sm:$0xff] %v981_v4  ;;  %s2675_s6 = scalar_lea.vmem %s2605_s24, %s1565_s22 [#allocation4]   ;;  %s1043_s16 = scalar_lea.vmem %s2608_s25, %s1565_s22  }
 0x207   : >> { %984 = vst [vmem:[%s1962_s26 + $0xc8] sm:$0xff] %v983_v5  ;;  %v985_v6 = vld [vmem:[%s1966_s29 + $0xc0] sm:$0xff] }
 0x208   : >> { %v987_v7 = vld [vmem:[%s1966_s29 + $0xe0] sm:$0xff]  ;;  %986 = vst [vmem:[%s1962_s26 + $0xf0] sm:$0xff] %v985_v6 }
 0x209   : >> { %v989_v8 = vld [vmem:[%s1966_s29 + $0x100] sm:$0xff]  ;;  %988 = vst [vmem:[%s1962_s26 + $0x118] sm:$0xff] %v987_v7 }
 0x20a   : >> { %990 = vst [vmem:[%s1962_s26 + $0x140] sm:$0xff] %v989_v8  ;;  %v991_v9 = vld [vmem:[%s1966_s29 + $0x120] sm:$0xff] }
 0x20b   : >> { %v993_v10 = vld [vmem:[%s1966_s29 + $0x140] sm:$0xff]  ;;  %992 = vst [vmem:[%s1962_s26 + $0x168] sm:$0xff] %v991_v9 }
 0x20c   : >> { %v995_v11 = vld [vmem:[%s1966_s29 + $0x160] sm:$0xff]  ;;  %994 = vst [vmem:[%s1962_s26 + $0x190] sm:$0xff] %v993_v10 }
 0x20d   : >> { %996 = vst [vmem:[%s1962_s26 + $0x1b8] sm:$0xff] %v995_v11  ;;  %v997_v12 = vld [vmem:[%s1966_s29 + $0x180] sm:$0xff] }
 0x20e   : >> { %v999_v13 = vld [vmem:[%s1966_s29 + $0x1a0] sm:$0xff]  ;;  %998 = vst [vmem:[%s1962_s26 + $0x1e0] sm:$0xff] %v997_v12 }
 0x20f   : >> { %v1001_v14 = vld [vmem:[%s1966_s29 + $0x1c0] sm:$0xff]  ;;  %1000 = vst [vmem:[%s1962_s26 + $0x208] sm:$0xff] %v999_v13 }
 0x210   : >> { %1002 = vst [vmem:[%s1962_s26 + $0x230] sm:$0xff] %v1001_v14  ;;  %v1003_v15 = vld [vmem:[%s1966_s29 + $0x1e0] sm:$0xff] }
 0x211   : >> { %v1005_v16 = vld [vmem:[%s1966_s29 + $0x200] sm:$0xff]  ;;  %1004 = vst [vmem:[%s1962_s26 + $0x258] sm:$0xff] %v1003_v15 }
 0x212   : >> { %v1007_v17 = vld [vmem:[%s1966_s29 + $0x220] sm:$0xff]  ;;  %1006 = vst [vmem:[%s1962_s26 + $0x280] sm:$0xff] %v1005_v16 }
 0x213   : >> { %1008 = vst [vmem:[%s1962_s26 + $0x2a8] sm:$0xff] %v1007_v17  ;;  %v1009_v18 = vld [vmem:[%s1966_s29 + $0x240] sm:$0xff] }
 0x214   : >> { %v1011_v19 = vld [vmem:[%s1966_s29 + $0x260] sm:$0xff]  ;;  %1010 = vst [vmem:[%s1962_s26 + $0x2d0] sm:$0xff] %v1009_v18 }
 0x215   : >> { %v1013_v20 = vld [vmem:[%s1966_s29 + $0x280] sm:$0xff]  ;;  %1012 = vst [vmem:[%s1962_s26 + $0x2f8] sm:$0xff] %v1011_v19 }
 0x216   : >> { %1014 = vst [vmem:[%s1962_s26 + $0x320] sm:$0xff] %v1013_v20  ;;  %v1015_v21 = vld [vmem:[%s1966_s29 + $0x2a0] sm:$0xff] }
 0x217   : >> { %v1017_v22 = vld [vmem:[%s1966_s29 + $0x2c0] sm:$0xff]  ;;  %1016 = vst [vmem:[%s1962_s26 + $0x348] sm:$0xff] %v1015_v21 }
 0x218   : >> { %v1019_v23 = vld [vmem:[%s1966_s29 + $0x2e0] sm:$0xff]  ;;  %1018 = vst [vmem:[%s1962_s26 + $0x370] sm:$0xff] %v1017_v22 }
 0x219   : >> { %1020 = vst [vmem:[%s1962_s26 + $0x398] sm:$0xff] %v1019_v23  ;;  %v1021_v24 = vld [vmem:[%s1966_s29 + $0x300] sm:$0xff] }
 0x21a   : >> { %v1023_v25 = vld [vmem:[%s1966_s29 + $0x320] sm:$0xff]  ;;  %1022 = vst [vmem:[%s1962_s26 + $0x3c0] sm:$0xff] %v1021_v24 }
 0x21b   : >> { %v1025_v26 = vld [vmem:[%s1966_s29 + $0x340] sm:$0xff]  ;;  %1024 = vst [vmem:[%s1962_s26 + $0x3e8] sm:$0xff] %v1023_v25 }
 0x21c   : >> { %1026 = vst [vmem:[%s1962_s26 + $0x410] sm:$0xff] %v1025_v26  ;;  %v1027_v27 = vld [vmem:[%s1966_s29 + $0x360] sm:$0xff] }
 0x21d   : >> { %v1029_v28 = vld [vmem:[%s1966_s29 + $0x380] sm:$0xff]  ;;  %1028 = vst [vmem:[%s1962_s26 + $0x438] sm:$0xff] %v1027_v27  ;;  %969 = sbr.rel (!%p966_p0) target bundleno = 513 (0x201), region = 159 }
 0x21e   : >> { %v1031_v29 = vld [vmem:[%s1966_s29 + $0x3a0] sm:$0xff]  ;;  %1030 = vst [vmem:[%s1962_s26 + $0x460] sm:$0xff] %v1029_v28 }
 0x21f   : >> { %1032 = vst [vmem:[%s1962_s26 + $0x488] sm:$0xff] %v1031_v29  ;;  %v1033_v30 = vld [vmem:[%s1966_s29 + $0x3c0] sm:$0xff] }
 0x220   : >> { %v1035_v31 = vld [vmem:[%s1966_s29 + $0x3e0] sm:$0xff]  ;;  %1034 = vst [vmem:[%s1962_s26 + $0x4b0] sm:$0xff] %v1033_v30  ;;  %s3317_s29 = smov %s2675_s6 }
 0x221   : >> { %1036 = vst [vmem:[%s1962_s26 + $0x4d8] sm:$0xff] %v1035_v31  ;;  %s3316_s26 = smov %s1043_s16 }
 0x222 PF: > { %1046 = sbr.rel (%p801_p4) target bundleno = 666 (0x29a), region = 73  ;;  %s1048_s17 = ssub.s32 (!%p801_p4), %s2414_s2, %s2418_s9 }
 0x223   : > { %s1052_s19 = sshrl.u32 (!%p801_p4), %s2414_s2, 3  ;;  %s2721_s21 = scalar_lea.vmem (!%p801_p4), %s2211_s18, %s1048_s17 [#allocation4] }
 0x224   : > { %s2724_s28 = scalar_lea.vmem (!%p801_p4), %s2412_s27, %s1048_s17  ;;  %s2728_s5 = sshrl.u32 (!%p801_p4), %s1052_s19, 1 }
 0x225   : > { %p1567_p1 = scmp.le.s32.totalorder (!%p801_p4), %s2728_s5, 0 }
 0x227   : > { %1473 = sbr.rel (%p1567_p1) target bundleno = 589 (0x24d), region = 164  ;;  %s3319_s30 = smov (!%p1567_p1), %s2412_s27 }
 0x228   : > { %s3320_s20 = smov (!%p1567_p1), %s2211_s18  ;;  %s2737_s24 = smov (!%p1567_p1), 0  }
 0x229   : > { %s2739_s25 = smov (!%p1567_p1), 0  }
 0x22c LB: >> { %v1065_v32 = vld [vmem:[%s1982_s20] sm:$0xff]  ;;  %v1067_v33 = vld [vmem:[%s1982_s20 + $0x8] sm:$0xff]  ;;  %s1193_s26 = sadd.s32 1, %s1986_s24  ;;  %s1059_s25 = sadd.s32 1, %s1990_s25   ;;  %s1990_s25 = sphi %s2739_s25, %s1059_s25   ;;  %s1986_s24 = sphi %s2737_s24, %s3323_s24   ;;  %s1982_s20 = sphi %s3320_s20, %s3322_s20   ;;  %s1978_s30 = sphi %s3319_s30, %s3321_s30  }
 0x22d   : >> { %v1069_v34 = vld [vmem:[%s1982_s20 + $0x20] sm:$0xff]  ;;  %1066 = vst [vmem:[%s1978_s30] sm:$0xff] %v1065_v32  ;;  %1068 = vst [vmem:[%s1978_s30 + $0x8] sm:$0xff] %v1067_v33  ;;  %v1071_v35 = vld [vmem:[%s1982_s20 + $0x28] sm:$0xff]  ;;  %p1194_p2 = scmp.ge.s32.totalorder %s1193_s26, %s2728_s5  ;;  %p1058_p3 = scmp.ge.s32.totalorder %s1059_s25, %s2728_s5 }
 0x22e   : >> { %1070 = vst [vmem:[%s1978_s30 + $0x28] sm:$0xff] %v1069_v34  ;;  %v1073_v36 = vld [vmem:[%s1982_s20 + $0x40] sm:$0xff]  ;;  %v1075_v37 = vld [vmem:[%s1982_s20 + $0x48] sm:$0xff]  ;;  %1072 = vst [vmem:[%s1978_s30 + $0x30] sm:$0xff] %v1071_v35 }
 0x22f   : >> { %1074 = vst [vmem:[%s1978_s30 + $0x50] sm:$0xff] %v1073_v36  ;;  %1076 = vst [vmem:[%s1978_s30 + $0x58] sm:$0xff] %v1075_v37  ;;  %v1077_v38 = vld [vmem:[%s1982_s20 + $0x60] sm:$0xff]  ;;  %v1079_v39 = vld [vmem:[%s1982_s20 + $0x68] sm:$0xff]  ;;  %s3351_s26 = smov (%p1194_p2, %s1193_s26), 0 }
 0x230   : >> { %v1081_v40 = vld [vmem:[%s1982_s20 + $0x80] sm:$0xff]  ;;  %1078 = vst [vmem:[%s1978_s30 + $0x78] sm:$0xff] %v1077_v38  ;;  %1080 = vst [vmem:[%s1978_s30 + $0x80] sm:$0xff] %v1079_v39  ;;  %v1083_v41 = vld [vmem:[%s1982_s20 + $0x88] sm:$0xff]  ;;  %s1568_s29 = sshll.u32 %s3351_s26, 4  ;;  %s3323_s24 = smov %s3351_s26 }
 0x231   : >> { %1082 = vst [vmem:[%s1978_s30 + $0xa0] sm:$0xff] %v1081_v40  ;;  %v1085_v42 = vld [vmem:[%s1982_s20 + $0xa0] sm:$0xff]  ;;  %v1087_v43 = vld [vmem:[%s1982_s20 + $0xa8] sm:$0xff]  ;;  %1084 = vst [vmem:[%s1978_s30 + $0xa8] sm:$0xff] %v1083_v41  ;;  %s2795_s3 = scalar_lea.vmem %s2211_s18, %s1568_s29 [#allocation4]   ;;  %s2798_s4 = scalar_lea.vmem %s2412_s27, %s1568_s29  }
 0x232   : >> { %1086 = vst [vmem:[%s1978_s30 + $0xc8] sm:$0xff] %v1085_v42  ;;  %1088 = vst [vmem:[%s1978_s30 + $0xd0] sm:$0xff] %v1087_v43  ;;  %v1089_v44 = vld [vmem:[%s1982_s20 + $0xc0] sm:$0xff]  ;;  %v1091_v45 = vld [vmem:[%s1982_s20 + $0xc8] sm:$0xff] }
 0x233   : >> { %v1093_v46 = vld [vmem:[%s1982_s20 + $0xe0] sm:$0xff]  ;;  %1090 = vst [vmem:[%s1978_s30 + $0xf0] sm:$0xff] %v1089_v44  ;;  %1092 = vst [vmem:[%s1978_s30 + $0xf8] sm:$0xff] %v1091_v45  ;;  %v1095_v47 = vld [vmem:[%s1982_s20 + $0xe8] sm:$0xff] }
 0x234   : >> { %1094 = vst [vmem:[%s1978_s30 + $0x118] sm:$0xff] %v1093_v46  ;;  %v1097_v48 = vld [vmem:[%s1982_s20 + $0x100] sm:$0xff]  ;;  %v1099_v49 = vld [vmem:[%s1982_s20 + $0x108] sm:$0xff]  ;;  %1096 = vst [vmem:[%s1978_s30 + $0x120] sm:$0xff] %v1095_v47 }
 0x235   : >> { %1098 = vst [vmem:[%s1978_s30 + $0x140] sm:$0xff] %v1097_v48  ;;  %1100 = vst [vmem:[%s1978_s30 + $0x148] sm:$0xff] %v1099_v49  ;;  %v1101_v50 = vld [vmem:[%s1982_s20 + $0x120] sm:$0xff]  ;;  %v1103_v51 = vld [vmem:[%s1982_s20 + $0x128] sm:$0xff] }
 0x236   : >> { %v1105_v52 = vld [vmem:[%s1982_s20 + $0x140] sm:$0xff]  ;;  %1102 = vst [vmem:[%s1978_s30 + $0x168] sm:$0xff] %v1101_v50  ;;  %1104 = vst [vmem:[%s1978_s30 + $0x170] sm:$0xff] %v1103_v51  ;;  %v1107_v53 = vld [vmem:[%s1982_s20 + $0x148] sm:$0xff] }
 0x237   : >> { %1106 = vst [vmem:[%s1978_s30 + $0x190] sm:$0xff] %v1105_v52  ;;  %v1109_v54 = vld [vmem:[%s1982_s20 + $0x160] sm:$0xff]  ;;  %v1111_v55 = vld [vmem:[%s1982_s20 + $0x168] sm:$0xff]  ;;  %1108 = vst [vmem:[%s1978_s30 + $0x198] sm:$0xff] %v1107_v53 }
 0x238   : >> { %1110 = vst [vmem:[%s1978_s30 + $0x1b8] sm:$0xff] %v1109_v54  ;;  %1112 = vst [vmem:[%s1978_s30 + $0x1c0] sm:$0xff] %v1111_v55  ;;  %v1113_v56 = vld [vmem:[%s1982_s20 + $0x180] sm:$0xff]  ;;  %v1115_v57 = vld [vmem:[%s1982_s20 + $0x188] sm:$0xff] }
 0x239   : >> { %v1117_v58 = vld [vmem:[%s1982_s20 + $0x1a0] sm:$0xff]  ;;  %1114 = vst [vmem:[%s1978_s30 + $0x1e0] sm:$0xff] %v1113_v56  ;;  %1116 = vst [vmem:[%s1978_s30 + $0x1e8] sm:$0xff] %v1115_v57  ;;  %v1119_v59 = vld [vmem:[%s1982_s20 + $0x1a8] sm:$0xff] }
 0x23a   : >> { %1118 = vst [vmem:[%s1978_s30 + $0x208] sm:$0xff] %v1117_v58  ;;  %v1121_v60 = vld [vmem:[%s1982_s20 + $0x1c0] sm:$0xff]  ;;  %v1123_v61 = vld [vmem:[%s1982_s20 + $0x1c8] sm:$0xff]  ;;  %1120 = vst [vmem:[%s1978_s30 + $0x210] sm:$0xff] %v1119_v59 }
 0x23b   : >> { %1122 = vst [vmem:[%s1978_s30 + $0x230] sm:$0xff] %v1121_v60  ;;  %1124 = vst [vmem:[%s1978_s30 + $0x238] sm:$0xff] %v1123_v61  ;;  %v1125_v62 = vld [vmem:[%s1982_s20 + $0x1e0] sm:$0xff]  ;;  %v1127_v63 = vld [vmem:[%s1982_s20 + $0x1e8] sm:$0xff] }
 0x23c   : >> { %v1129_v0 = vld [vmem:[%s1982_s20 + $0x200] sm:$0xff]  ;;  %1126 = vst [vmem:[%s1978_s30 + $0x258] sm:$0xff] %v1125_v62  ;;  %1128 = vst [vmem:[%s1978_s30 + $0x260] sm:$0xff] %v1127_v63  ;;  %v1131_v1 = vld [vmem:[%s1982_s20 + $0x208] sm:$0xff] }
 0x23d   : >> { %1130 = vst [vmem:[%s1978_s30 + $0x280] sm:$0xff] %v1129_v0  ;;  %v1133_v2 = vld [vmem:[%s1982_s20 + $0x220] sm:$0xff]  ;;  %v1135_v3 = vld [vmem:[%s1982_s20 + $0x228] sm:$0xff]  ;;  %1132 = vst [vmem:[%s1978_s30 + $0x288] sm:$0xff] %v1131_v1 }
 0x23e   : >> { %1134 = vst [vmem:[%s1978_s30 + $0x2a8] sm:$0xff] %v1133_v2  ;;  %1136 = vst [vmem:[%s1978_s30 + $0x2b0] sm:$0xff] %v1135_v3  ;;  %v1137_v4 = vld [vmem:[%s1982_s20 + $0x240] sm:$0xff]  ;;  %v1139_v5 = vld [vmem:[%s1982_s20 + $0x248] sm:$0xff] }
 0x23f   : >> { %v1141_v6 = vld [vmem:[%s1982_s20 + $0x260] sm:$0xff]  ;;  %1138 = vst [vmem:[%s1978_s30 + $0x2d0] sm:$0xff] %v1137_v4  ;;  %1140 = vst [vmem:[%s1978_s30 + $0x2d8] sm:$0xff] %v1139_v5  ;;  %v1143_v7 = vld [vmem:[%s1982_s20 + $0x268] sm:$0xff] }
 0x240   : >> { %1142 = vst [vmem:[%s1978_s30 + $0x2f8] sm:$0xff] %v1141_v6  ;;  %v1145_v8 = vld [vmem:[%s1982_s20 + $0x280] sm:$0xff]  ;;  %v1147_v9 = vld [vmem:[%s1982_s20 + $0x288] sm:$0xff]  ;;  %1144 = vst [vmem:[%s1978_s30 + $0x300] sm:$0xff] %v1143_v7 }
 0x241   : >> { %1146 = vst [vmem:[%s1978_s30 + $0x320] sm:$0xff] %v1145_v8  ;;  %1148 = vst [vmem:[%s1978_s30 + $0x328] sm:$0xff] %v1147_v9  ;;  %v1149_v10 = vld [vmem:[%s1982_s20 + $0x2a0] sm:$0xff]  ;;  %v1151_v11 = vld [vmem:[%s1982_s20 + $0x2a8] sm:$0xff] }
 0x242   : >> { %v1153_v12 = vld [vmem:[%s1982_s20 + $0x2c0] sm:$0xff]  ;;  %1150 = vst [vmem:[%s1978_s30 + $0x348] sm:$0xff] %v1149_v10  ;;  %1152 = vst [vmem:[%s1978_s30 + $0x350] sm:$0xff] %v1151_v11  ;;  %v1155_v13 = vld [vmem:[%s1982_s20 + $0x2c8] sm:$0xff] }
 0x243   : >> { %1154 = vst [vmem:[%s1978_s30 + $0x370] sm:$0xff] %v1153_v12  ;;  %v1157_v14 = vld [vmem:[%s1982_s20 + $0x2e0] sm:$0xff]  ;;  %v1159_v15 = vld [vmem:[%s1982_s20 + $0x2e8] sm:$0xff]  ;;  %1156 = vst [vmem:[%s1978_s30 + $0x378] sm:$0xff] %v1155_v13 }
 0x244   : >> { %1158 = vst [vmem:[%s1978_s30 + $0x398] sm:$0xff] %v1157_v14  ;;  %1160 = vst [vmem:[%s1978_s30 + $0x3a0] sm:$0xff] %v1159_v15  ;;  %v1161_v16 = vld [vmem:[%s1982_s20 + $0x300] sm:$0xff]  ;;  %v1163_v17 = vld [vmem:[%s1982_s20 + $0x308] sm:$0xff] }
 0x245   : >> { %v1165_v18 = vld [vmem:[%s1982_s20 + $0x320] sm:$0xff]  ;;  %1162 = vst [vmem:[%s1978_s30 + $0x3c0] sm:$0xff] %v1161_v16  ;;  %1164 = vst [vmem:[%s1978_s30 + $0x3c8] sm:$0xff] %v1163_v17  ;;  %v1167_v19 = vld [vmem:[%s1982_s20 + $0x328] sm:$0xff] }
 0x246   : >> { %1166 = vst [vmem:[%s1978_s30 + $0x3e8] sm:$0xff] %v1165_v18  ;;  %v1169_v20 = vld [vmem:[%s1982_s20 + $0x340] sm:$0xff]  ;;  %v1171_v21 = vld [vmem:[%s1982_s20 + $0x348] sm:$0xff]  ;;  %1168 = vst [vmem:[%s1978_s30 + $0x3f0] sm:$0xff] %v1167_v19 }
 0x247   : >> { %1170 = vst [vmem:[%s1978_s30 + $0x410] sm:$0xff] %v1169_v20  ;;  %1172 = vst [vmem:[%s1978_s30 + $0x418] sm:$0xff] %v1171_v21  ;;  %v1173_v22 = vld [vmem:[%s1982_s20 + $0x360] sm:$0xff]  ;;  %v1175_v23 = vld [vmem:[%s1982_s20 + $0x368] sm:$0xff] }
 0x248   : >> { %v1177_v24 = vld [vmem:[%s1982_s20 + $0x380] sm:$0xff]  ;;  %1174 = vst [vmem:[%s1978_s30 + $0x438] sm:$0xff] %v1173_v22  ;;  %1176 = vst [vmem:[%s1978_s30 + $0x440] sm:$0xff] %v1175_v23  ;;  %v1179_v25 = vld [vmem:[%s1982_s20 + $0x388] sm:$0xff]  ;;  %1061 = sbr.rel (!%p1058_p3) target bundleno = 556 (0x22c), region = 170 }
 0x249   : >> { %1178 = vst [vmem:[%s1978_s30 + $0x460] sm:$0xff] %v1177_v24  ;;  %v1181_v26 = vld [vmem:[%s1982_s20 + $0x3a0] sm:$0xff]  ;;  %v1183_v27 = vld [vmem:[%s1982_s20 + $0x3a8] sm:$0xff]  ;;  %1180 = vst [vmem:[%s1978_s30 + $0x468] sm:$0xff] %v1179_v25 }
 0x24a   : >> { %1182 = vst [vmem:[%s1978_s30 + $0x488] sm:$0xff] %v1181_v26  ;;  %1184 = vst [vmem:[%s1978_s30 + $0x490] sm:$0xff] %v1183_v27  ;;  %v1185_v28 = vld [vmem:[%s1982_s20 + $0x3c0] sm:$0xff]  ;;  %v1187_v29 = vld [vmem:[%s1982_s20 + $0x3c8] sm:$0xff] }
 0x24b   : >> { %v1189_v30 = vld [vmem:[%s1982_s20 + $0x3e0] sm:$0xff]  ;;  %1186 = vst [vmem:[%s1978_s30 + $0x4b0] sm:$0xff] %v1185_v28  ;;  %1188 = vst [vmem:[%s1978_s30 + $0x4b8] sm:$0xff] %v1187_v29  ;;  %v1191_v31 = vld [vmem:[%s1982_s20 + $0x3e8] sm:$0xff]  ;;  %s3322_s20 = smov %s2795_s3 }
 0x24c   : >> { %1190 = vst [vmem:[%s1978_s30 + $0x4d8] sm:$0xff] %v1189_v30  ;;  %1192 = vst [vmem:[%s1978_s30 + $0x4e0] sm:$0xff] %v1191_v31  ;;  %s3321_s30 = smov %s2798_s4 }
 0x24d PF: > { %s2904_s10 = sand.u32 1, %s1052_s19   ;;  %s1585_s22 = sshll.u32 %s2728_s5, 8 }
 0x24e   : > { %s1204_s6 = sshra.s32 %s1585_s22, 4  ;;  %p1573_p7 = scmp.le.s32.totalorder %s2904_s10, 0 }
 0x24f   : > { %s2908_s16 = scalar_lea.vmem %s2211_s18, %s1204_s6 [#allocation4]   ;;  %s2911_s17 = scalar_lea.vmem %s2412_s27, %s1204_s6  }
 0x250   : > { %1487 = sbr.rel (%p1573_p7) target bundleno = 630 (0x276), region = 175  ;;  %s3324_s30 = smov (!%p1573_p7), %s2911_s17 }
 0x251   : > { %s3325_s20 = smov (!%p1573_p7), %s2908_s16  ;;  %s2920_s24 = smov (!%p1573_p7), 0  }
 0x252   : > { %s2922_s25 = smov (!%p1573_p7), 0  }
 0x255 LB: >> { %v1220_v32 = vld [vmem:[%s1998_s20] sm:$0xff]  ;;  %s1284_s19 = sadd.s32 1, %s2002_s24  ;;  %s1214_s25 = sadd.s32 1, %s2006_s25   ;;  %s2006_s25 = sphi %s2922_s25, %s1214_s25   ;;  %s2002_s24 = sphi %s2920_s24, %s3328_s24   ;;  %s1998_s20 = sphi %s3325_s20, %s3327_s20   ;;  %s1994_s30 = sphi %s3324_s30, %s3326_s30  }
 0x256   : >> { %v1222_v33 = vld [vmem:[%s1998_s20 + $0x20] sm:$0xff]  ;;  %1221 = vst [vmem:[%s1994_s30] sm:$0xff] %v1220_v32  ;;  %p1285_p13 = scmp.ge.s32.totalorder %s1284_s19, %s2904_s10  ;;  %p1213_p9 = scmp.ge.s32.totalorder %s1214_s25, %s2904_s10 }
 0x257   : >> { %v1224_v34 = vld [vmem:[%s1998_s20 + $0x40] sm:$0xff]  ;;  %1223 = vst [vmem:[%s1994_s30 + $0x28] sm:$0xff] %v1222_v33 }
 0x258   : >> { %1225 = vst [vmem:[%s1994_s30 + $0x50] sm:$0xff] %v1224_v34  ;;  %v1226_v35 = vld [vmem:[%s1998_s20 + $0x60] sm:$0xff]  ;;  %s3353_s19 = smov (%p1285_p13, %s1284_s19), 0 }
 0x259   : >> { %v1228_v36 = vld [vmem:[%s1998_s20 + $0x80] sm:$0xff]  ;;  %1227 = vst [vmem:[%s1994_s30 + $0x78] sm:$0xff] %v1226_v35  ;;  %s1574_s5 = sshll.u32 %s3353_s19, 3  ;;  %s3328_s24 = smov %s3353_s19 }
 0x25a   : >> { %v1230_v37 = vld [vmem:[%s1998_s20 + $0xa0] sm:$0xff]  ;;  %1229 = vst [vmem:[%s1994_s30 + $0xa0] sm:$0xff] %v1228_v36  ;;  %s2978_s26 = scalar_lea.vmem %s2908_s16, %s1574_s5 [#allocation4]   ;;  %s1290_s29 = scalar_lea.vmem %s2911_s17, %s1574_s5  }
 0x25b   : >> { %1231 = vst [vmem:[%s1994_s30 + $0xc8] sm:$0xff] %v1230_v37  ;;  %v1232_v38 = vld [vmem:[%s1998_s20 + $0xc0] sm:$0xff] }
 0x25c   : >> { %v1234_v39 = vld [vmem:[%s1998_s20 + $0xe0] sm:$0xff]  ;;  %1233 = vst [vmem:[%s1994_s30 + $0xf0] sm:$0xff] %v1232_v38 }
 0x25d   : >> { %v1236_v40 = vld [vmem:[%s1998_s20 + $0x100] sm:$0xff]  ;;  %1235 = vst [vmem:[%s1994_s30 + $0x118] sm:$0xff] %v1234_v39 }
 0x25e   : >> { %1237 = vst [vmem:[%s1994_s30 + $0x140] sm:$0xff] %v1236_v40  ;;  %v1238_v41 = vld [vmem:[%s1998_s20 + $0x120] sm:$0xff] }
 0x25f   : >> { %v1240_v42 = vld [vmem:[%s1998_s20 + $0x140] sm:$0xff]  ;;  %1239 = vst [vmem:[%s1994_s30 + $0x168] sm:$0xff] %v1238_v41 }
 0x260   : >> { %v1242_v43 = vld [vmem:[%s1998_s20 + $0x160] sm:$0xff]  ;;  %1241 = vst [vmem:[%s1994_s30 + $0x190] sm:$0xff] %v1240_v42 }
 0x261   : >> { %1243 = vst [vmem:[%s1994_s30 + $0x1b8] sm:$0xff] %v1242_v43  ;;  %v1244_v44 = vld [vmem:[%s1998_s20 + $0x180] sm:$0xff] }
 0x262   : >> { %v1246_v45 = vld [vmem:[%s1998_s20 + $0x1a0] sm:$0xff]  ;;  %1245 = vst [vmem:[%s1994_s30 + $0x1e0] sm:$0xff] %v1244_v44 }
 0x263   : >> { %v1248_v46 = vld [vmem:[%s1998_s20 + $0x1c0] sm:$0xff]  ;;  %1247 = vst [vmem:[%s1994_s30 + $0x208] sm:$0xff] %v1246_v45 }
 0x264   : >> { %1249 = vst [vmem:[%s1994_s30 + $0x230] sm:$0xff] %v1248_v46  ;;  %v1250_v47 = vld [vmem:[%s1998_s20 + $0x1e0] sm:$0xff] }
 0x265   : >> { %v1252_v48 = vld [vmem:[%s1998_s20 + $0x200] sm:$0xff]  ;;  %1251 = vst [vmem:[%s1994_s30 + $0x258] sm:$0xff] %v1250_v47 }
 0x266   : >> { %v1254_v49 = vld [vmem:[%s1998_s20 + $0x220] sm:$0xff]  ;;  %1253 = vst [vmem:[%s1994_s30 + $0x280] sm:$0xff] %v1252_v48 }
 0x267   : >> { %1255 = vst [vmem:[%s1994_s30 + $0x2a8] sm:$0xff] %v1254_v49  ;;  %v1256_v50 = vld [vmem:[%s1998_s20 + $0x240] sm:$0xff] }
 0x268   : >> { %v1258_v51 = vld [vmem:[%s1998_s20 + $0x260] sm:$0xff]  ;;  %1257 = vst [vmem:[%s1994_s30 + $0x2d0] sm:$0xff] %v1256_v50 }
 0x269   : >> { %v1260_v52 = vld [vmem:[%s1998_s20 + $0x280] sm:$0xff]  ;;  %1259 = vst [vmem:[%s1994_s30 + $0x2f8] sm:$0xff] %v1258_v51 }
 0x26a   : >> { %1261 = vst [vmem:[%s1994_s30 + $0x320] sm:$0xff] %v1260_v52  ;;  %v1262_v53 = vld [vmem:[%s1998_s20 + $0x2a0] sm:$0xff] }
 0x26b   : >> { %v1264_v54 = vld [vmem:[%s1998_s20 + $0x2c0] sm:$0xff]  ;;  %1263 = vst [vmem:[%s1994_s30 + $0x348] sm:$0xff] %v1262_v53 }
 0x26c   : >> { %v1266_v55 = vld [vmem:[%s1998_s20 + $0x2e0] sm:$0xff]  ;;  %1265 = vst [vmem:[%s1994_s30 + $0x370] sm:$0xff] %v1264_v54 }
 0x26d   : >> { %1267 = vst [vmem:[%s1994_s30 + $0x398] sm:$0xff] %v1266_v55  ;;  %v1268_v56 = vld [vmem:[%s1998_s20 + $0x300] sm:$0xff] }
 0x26e   : >> { %v1270_v57 = vld [vmem:[%s1998_s20 + $0x320] sm:$0xff]  ;;  %1269 = vst [vmem:[%s1994_s30 + $0x3c0] sm:$0xff] %v1268_v56 }
 0x26f   : >> { %v1272_v58 = vld [vmem:[%s1998_s20 + $0x340] sm:$0xff]  ;;  %1271 = vst [vmem:[%s1994_s30 + $0x3e8] sm:$0xff] %v1270_v57 }
 0x270   : >> { %1273 = vst [vmem:[%s1994_s30 + $0x410] sm:$0xff] %v1272_v58  ;;  %v1274_v59 = vld [vmem:[%s1998_s20 + $0x360] sm:$0xff] }
 0x271   : >> { %v1276_v60 = vld [vmem:[%s1998_s20 + $0x380] sm:$0xff]  ;;  %1275 = vst [vmem:[%s1994_s30 + $0x438] sm:$0xff] %v1274_v59  ;;  %1216 = sbr.rel (!%p1213_p9) target bundleno = 597 (0x255), region = 181 }
 0x272   : >> { %v1278_v61 = vld [vmem:[%s1998_s20 + $0x3a0] sm:$0xff]  ;;  %1277 = vst [vmem:[%s1994_s30 + $0x460] sm:$0xff] %v1276_v60 }
 0x273   : >> { %1279 = vst [vmem:[%s1994_s30 + $0x488] sm:$0xff] %v1278_v61  ;;  %v1280_v62 = vld [vmem:[%s1998_s20 + $0x3c0] sm:$0xff] }
 0x274   : >> { %v1282_v63 = vld [vmem:[%s1998_s20 + $0x3e0] sm:$0xff]  ;;  %1281 = vst [vmem:[%s1994_s30 + $0x4b0] sm:$0xff] %v1280_v62  ;;  %s3327_s20 = smov %s2978_s26 }
 0x275   : >> { %1283 = vst [vmem:[%s1994_s30 + $0x4d8] sm:$0xff] %v1282_v63  ;;  %s3326_s30 = smov %s1290_s29 }
 0x276 PF: > { %s2011_s3 = smov 1  }
 0x277   : > { %s1291_s4 = sshll.u32 %s2011_s3, %s2418_s9 }
 0x278   : > { %s3019_s22 = sadd.s32 4294967295, %s1291_s4 }
 0x279   : > { %v1301_v0 = vld [vmem:[%s2721_s21] sm:%s3019_s22] }
 0x27a   : > { %v1303_v1 = vld [vmem:[%s2721_s21 + $0x20] sm:%s3019_s22]  ;;  %1302 = vst [vmem:[%s2724_s28] sm:%s3019_s22] %v1301_v0 }
 0x27b   : > { %1304 = vst [vmem:[%s2724_s28 + $0x28] sm:%s3019_s22] %v1303_v1  ;;  %v1305_v2 = vld [vmem:[%s2721_s21 + $0x40] sm:%s3019_s22] }
 0x27c   : > { %v1307_v3 = vld [vmem:[%s2721_s21 + $0x60] sm:%s3019_s22]  ;;  %1306 = vst [vmem:[%s2724_s28 + $0x50] sm:%s3019_s22] %v1305_v2 }
 0x27d   : > { %1308 = vst [vmem:[%s2724_s28 + $0x78] sm:%s3019_s22] %v1307_v3  ;;  %v1309_v4 = vld [vmem:[%s2721_s21 + $0x80] sm:%s3019_s22] }
 0x27e   : > { %v1311_v5 = vld [vmem:[%s2721_s21 + $0xa0] sm:%s3019_s22]  ;;  %1310 = vst [vmem:[%s2724_s28 + $0xa0] sm:%s3019_s22] %v1309_v4 }
 0x27f   : > { %1312 = vst [vmem:[%s2724_s28 + $0xc8] sm:%s3019_s22] %v1311_v5  ;;  %v1313_v6 = vld [vmem:[%s2721_s21 + $0xc0] sm:%s3019_s22] }
 0x280   : > { %v1315_v7 = vld [vmem:[%s2721_s21 + $0xe0] sm:%s3019_s22]  ;;  %1314 = vst [vmem:[%s2724_s28 + $0xf0] sm:%s3019_s22] %v1313_v6 }
 0x281   : > { %1316 = vst [vmem:[%s2724_s28 + $0x118] sm:%s3019_s22] %v1315_v7  ;;  %v1317_v8 = vld [vmem:[%s2721_s21 + $0x100] sm:%s3019_s22] }
 0x282   : > { %v1319_v9 = vld [vmem:[%s2721_s21 + $0x120] sm:%s3019_s22]  ;;  %1318 = vst [vmem:[%s2724_s28 + $0x140] sm:%s3019_s22] %v1317_v8 }
 0x283   : > { %1320 = vst [vmem:[%s2724_s28 + $0x168] sm:%s3019_s22] %v1319_v9  ;;  %v1321_v10 = vld [vmem:[%s2721_s21 + $0x140] sm:%s3019_s22] }
 0x284   : > { %v1323_v11 = vld [vmem:[%s2721_s21 + $0x160] sm:%s3019_s22]  ;;  %1322 = vst [vmem:[%s2724_s28 + $0x190] sm:%s3019_s22] %v1321_v10 }
 0x285   : > { %1324 = vst [vmem:[%s2724_s28 + $0x1b8] sm:%s3019_s22] %v1323_v11  ;;  %v1325_v12 = vld [vmem:[%s2721_s21 + $0x180] sm:%s3019_s22] }
 0x286   : > { %v1327_v13 = vld [vmem:[%s2721_s21 + $0x1a0] sm:%s3019_s22]  ;;  %1326 = vst [vmem:[%s2724_s28 + $0x1e0] sm:%s3019_s22] %v1325_v12 }
 0x287   : > { %1328 = vst [vmem:[%s2724_s28 + $0x208] sm:%s3019_s22] %v1327_v13  ;;  %v1329_v14 = vld [vmem:[%s2721_s21 + $0x1c0] sm:%s3019_s22] }
 0x288   : > { %v1331_v15 = vld [vmem:[%s2721_s21 + $0x1e0] sm:%s3019_s22]  ;;  %1330 = vst [vmem:[%s2724_s28 + $0x230] sm:%s3019_s22] %v1329_v14 }
 0x289   : > { %1332 = vst [vmem:[%s2724_s28 + $0x258] sm:%s3019_s22] %v1331_v15  ;;  %v1333_v16 = vld [vmem:[%s2721_s21 + $0x200] sm:%s3019_s22] }
 0x28a   : > { %v1335_v17 = vld [vmem:[%s2721_s21 + $0x220] sm:%s3019_s22]  ;;  %1334 = vst [vmem:[%s2724_s28 + $0x280] sm:%s3019_s22] %v1333_v16 }
 0x28b   : > { %1336 = vst [vmem:[%s2724_s28 + $0x2a8] sm:%s3019_s22] %v1335_v17  ;;  %v1337_v18 = vld [vmem:[%s2721_s21 + $0x240] sm:%s3019_s22] }
 0x28c   : > { %v1339_v19 = vld [vmem:[%s2721_s21 + $0x260] sm:%s3019_s22]  ;;  %1338 = vst [vmem:[%s2724_s28 + $0x2d0] sm:%s3019_s22] %v1337_v18 }
 0x28d   : > { %1340 = vst [vmem:[%s2724_s28 + $0x2f8] sm:%s3019_s22] %v1339_v19  ;;  %v1341_v20 = vld [vmem:[%s2721_s21 + $0x280] sm:%s3019_s22] }
 0x28e   : > { %v1343_v21 = vld [vmem:[%s2721_s21 + $0x2a0] sm:%s3019_s22]  ;;  %1342 = vst [vmem:[%s2724_s28 + $0x320] sm:%s3019_s22] %v1341_v20 }
 0x28f   : > { %1344 = vst [vmem:[%s2724_s28 + $0x348] sm:%s3019_s22] %v1343_v21  ;;  %v1345_v22 = vld [vmem:[%s2721_s21 + $0x2c0] sm:%s3019_s22] }
 0x290   : > { %v1347_v23 = vld [vmem:[%s2721_s21 + $0x2e0] sm:%s3019_s22]  ;;  %1346 = vst [vmem:[%s2724_s28 + $0x370] sm:%s3019_s22] %v1345_v22 }
 0x291   : > { %1348 = vst [vmem:[%s2724_s28 + $0x398] sm:%s3019_s22] %v1347_v23  ;;  %v1349_v24 = vld [vmem:[%s2721_s21 + $0x300] sm:%s3019_s22] }
 0x292   : > { %v1351_v25 = vld [vmem:[%s2721_s21 + $0x320] sm:%s3019_s22]  ;;  %1350 = vst [vmem:[%s2724_s28 + $0x3c0] sm:%s3019_s22] %v1349_v24 }
 0x293   : > { %1352 = vst [vmem:[%s2724_s28 + $0x3e8] sm:%s3019_s22] %v1351_v25  ;;  %v1353_v26 = vld [vmem:[%s2721_s21 + $0x340] sm:%s3019_s22] }
 0x294   : > { %v1355_v27 = vld [vmem:[%s2721_s21 + $0x360] sm:%s3019_s22]  ;;  %1354 = vst [vmem:[%s2724_s28 + $0x410] sm:%s3019_s22] %v1353_v26 }
 0x295   : > { %1356 = vst [vmem:[%s2724_s28 + $0x438] sm:%s3019_s22] %v1355_v27  ;;  %v1357_v28 = vld [vmem:[%s2721_s21 + $0x380] sm:%s3019_s22] }
 0x296   : > { %v1359_v29 = vld [vmem:[%s2721_s21 + $0x3a0] sm:%s3019_s22]  ;;  %1358 = vst [vmem:[%s2724_s28 + $0x460] sm:%s3019_s22] %v1357_v28 }
 0x297   : > { %1360 = vst [vmem:[%s2724_s28 + $0x488] sm:%s3019_s22] %v1359_v29  ;;  %v1361_v30 = vld [vmem:[%s2721_s21 + $0x3c0] sm:%s3019_s22] }
 0x298   : > { %v1363_v31 = vld [vmem:[%s2721_s21 + $0x3e0] sm:%s3019_s22]  ;;  %1362 = vst [vmem:[%s2724_s28 + $0x4b0] sm:%s3019_s22] %v1361_v30 }
 0x299   : > { %1364 = vst [vmem:[%s2724_s28 + $0x4d8] sm:%s3019_s22] %v1363_v31 }
 0x29a PF: > { %p1577_p4 = scmp.ge.u32.totalorder %s2414_s2, 8 }
 0x29b   : > { %s2012_s9 = smov (!%p1577_p4), 1  }
 0x29c   : > { %725 = sbr.rel (%p1577_p4) target bundleno = 706 (0x2c2), region = 44  ;;  %s726_s21 = sshll.u32 (!%p1577_p4), %s2012_s9, %s2414_s2 }
 0x29d   : > { %s3151_s28 = sadd.s32 (!%p1577_p4), 4294967295, %s726_s21 }
 0x2a1   : > { %v736_v32 = vld [vmem:[%s2211_s18] sm:%s3151_s28] }
 0x2a2   : > { %v738_v33 = vld [vmem:[%s2211_s18 + $0x20] sm:%s3151_s28]  ;;  %737 = vst [vmem:[%s2412_s27] sm:%s3151_s28] %v736_v32 }
 0x2a3   : > { %739 = vst [vmem:[%s2412_s27 + $0x28] sm:%s3151_s28] %v738_v33  ;;  %v740_v34 = vld [vmem:[%s2211_s18 + $0x40] sm:%s3151_s28] }
 0x2a4   : > { %v742_v35 = vld [vmem:[%s2211_s18 + $0x60] sm:%s3151_s28]  ;;  %741 = vst [vmem:[%s2412_s27 + $0x50] sm:%s3151_s28] %v740_v34 }
 0x2a5   : > { %743 = vst [vmem:[%s2412_s27 + $0x78] sm:%s3151_s28] %v742_v35  ;;  %v744_v36 = vld [vmem:[%s2211_s18 + $0x80] sm:%s3151_s28] }
 0x2a6   : > { %v746_v37 = vld [vmem:[%s2211_s18 + $0xa0] sm:%s3151_s28]  ;;  %745 = vst [vmem:[%s2412_s27 + $0xa0] sm:%s3151_s28] %v744_v36 }
 0x2a7   : > { %747 = vst [vmem:[%s2412_s27 + $0xc8] sm:%s3151_s28] %v746_v37  ;;  %v748_v38 = vld [vmem:[%s2211_s18 + $0xc0] sm:%s3151_s28] }
 0x2a8   : > { %v750_v39 = vld [vmem:[%s2211_s18 + $0xe0] sm:%s3151_s28]  ;;  %749 = vst [vmem:[%s2412_s27 + $0xf0] sm:%s3151_s28] %v748_v38 }
 0x2a9   : > { %751 = vst [vmem:[%s2412_s27 + $0x118] sm:%s3151_s28] %v750_v39  ;;  %v752_v40 = vld [vmem:[%s2211_s18 + $0x100] sm:%s3151_s28] }
 0x2aa   : > { %v754_v41 = vld [vmem:[%s2211_s18 + $0x120] sm:%s3151_s28]  ;;  %753 = vst [vmem:[%s2412_s27 + $0x140] sm:%s3151_s28] %v752_v40 }
 0x2ab   : > { %755 = vst [vmem:[%s2412_s27 + $0x168] sm:%s3151_s28] %v754_v41  ;;  %v756_v42 = vld [vmem:[%s2211_s18 + $0x140] sm:%s3151_s28] }
 0x2ac   : > { %v758_v43 = vld [vmem:[%s2211_s18 + $0x160] sm:%s3151_s28]  ;;  %757 = vst [vmem:[%s2412_s27 + $0x190] sm:%s3151_s28] %v756_v42 }
 0x2ad   : > { %759 = vst [vmem:[%s2412_s27 + $0x1b8] sm:%s3151_s28] %v758_v43  ;;  %v760_v44 = vld [vmem:[%s2211_s18 + $0x180] sm:%s3151_s28] }
 0x2ae   : > { %v762_v45 = vld [vmem:[%s2211_s18 + $0x1a0] sm:%s3151_s28]  ;;  %761 = vst [vmem:[%s2412_s27 + $0x1e0] sm:%s3151_s28] %v760_v44 }
 0x2af   : > { %763 = vst [vmem:[%s2412_s27 + $0x208] sm:%s3151_s28] %v762_v45  ;;  %v764_v46 = vld [vmem:[%s2211_s18 + $0x1c0] sm:%s3151_s28] }
 0x2b0   : > { %v766_v47 = vld [vmem:[%s2211_s18 + $0x1e0] sm:%s3151_s28]  ;;  %765 = vst [vmem:[%s2412_s27 + $0x230] sm:%s3151_s28] %v764_v46 }
 0x2b1   : > { %767 = vst [vmem:[%s2412_s27 + $0x258] sm:%s3151_s28] %v766_v47  ;;  %v768_v48 = vld [vmem:[%s2211_s18 + $0x200] sm:%s3151_s28] }
 0x2b2   : > { %v770_v49 = vld [vmem:[%s2211_s18 + $0x220] sm:%s3151_s28]  ;;  %769 = vst [vmem:[%s2412_s27 + $0x280] sm:%s3151_s28] %v768_v48 }
 0x2b3   : > { %771 = vst [vmem:[%s2412_s27 + $0x2a8] sm:%s3151_s28] %v770_v49  ;;  %v772_v50 = vld [vmem:[%s2211_s18 + $0x240] sm:%s3151_s28] }
 0x2b4   : > { %v774_v51 = vld [vmem:[%s2211_s18 + $0x260] sm:%s3151_s28]  ;;  %773 = vst [vmem:[%s2412_s27 + $0x2d0] sm:%s3151_s28] %v772_v50 }
 0x2b5   : > { %775 = vst [vmem:[%s2412_s27 + $0x2f8] sm:%s3151_s28] %v774_v51  ;;  %v776_v52 = vld [vmem:[%s2211_s18 + $0x280] sm:%s3151_s28] }
 0x2b6   : > { %v778_v53 = vld [vmem:[%s2211_s18 + $0x2a0] sm:%s3151_s28]  ;;  %777 = vst [vmem:[%s2412_s27 + $0x320] sm:%s3151_s28] %v776_v52 }
 0x2b7   : > { %779 = vst [vmem:[%s2412_s27 + $0x348] sm:%s3151_s28] %v778_v53  ;;  %v780_v54 = vld [vmem:[%s2211_s18 + $0x2c0] sm:%s3151_s28] }
 0x2b8   : > { %v782_v55 = vld [vmem:[%s2211_s18 + $0x2e0] sm:%s3151_s28]  ;;  %781 = vst [vmem:[%s2412_s27 + $0x370] sm:%s3151_s28] %v780_v54 }
 0x2b9   : > { %783 = vst [vmem:[%s2412_s27 + $0x398] sm:%s3151_s28] %v782_v55  ;;  %v784_v56 = vld [vmem:[%s2211_s18 + $0x300] sm:%s3151_s28] }
 0x2ba   : > { %v786_v57 = vld [vmem:[%s2211_s18 + $0x320] sm:%s3151_s28]  ;;  %785 = vst [vmem:[%s2412_s27 + $0x3c0] sm:%s3151_s28] %v784_v56 }
 0x2bb   : > { %787 = vst [vmem:[%s2412_s27 + $0x3e8] sm:%s3151_s28] %v786_v57  ;;  %v788_v58 = vld [vmem:[%s2211_s18 + $0x340] sm:%s3151_s28] }
 0x2bc   : > { %v790_v59 = vld [vmem:[%s2211_s18 + $0x360] sm:%s3151_s28]  ;;  %789 = vst [vmem:[%s2412_s27 + $0x410] sm:%s3151_s28] %v788_v58 }
 0x2bd   : > { %791 = vst [vmem:[%s2412_s27 + $0x438] sm:%s3151_s28] %v790_v59  ;;  %v792_v60 = vld [vmem:[%s2211_s18 + $0x380] sm:%s3151_s28] }
 0x2be   : > { %v794_v61 = vld [vmem:[%s2211_s18 + $0x3a0] sm:%s3151_s28]  ;;  %793 = vst [vmem:[%s2412_s27 + $0x460] sm:%s3151_s28] %v792_v60 }
 0x2bf   : > { %795 = vst [vmem:[%s2412_s27 + $0x488] sm:%s3151_s28] %v794_v61  ;;  %v796_v62 = vld [vmem:[%s2211_s18 + $0x3c0] sm:%s3151_s28] }
 0x2c0   : > { %v798_v63 = vld [vmem:[%s2211_s18 + $0x3e0] sm:%s3151_s28]  ;;  %797 = vst [vmem:[%s2412_s27 + $0x4b0] sm:%s3151_s28] %v796_v62 }
 0x2c1   : > { %799 = vst [vmem:[%s2412_s27 + $0x4d8] sm:%s3151_s28] %v798_v63 }
 0x2c2 PF: > { %s14_s13 = sadd.s32 1, %s1942_s13   ;;  %s3329_s6 = smov %s1918_s7 }
 0x2c3   : > { %p11_p5 = scmp.ge.s32.totalorder %s14_s13, 6   ;;  %s3330_s7 = smov %s1922_s8 }
 0x2c4   : > { %s3331_s8 = smov %s2093_s23  ;;  %s3332_s9 = smov %s1934_s11 }
 0x2c5   : > { %s3333_s10 = smov %s1938_s12  ;;  %s3334_s11 = smov %s3337_s14 }
 0x2c6   : > { %s3335_s12 = smov %s3341_s15  ;;  %13 = sbr.rel (!%p11_p5) target bundleno = 5 (0x5), region = 192 }
 0x2cb   :  { %1378 = vsyncpa [#allocation3], 1 }
 0x2cc   :  { %1380 = vsyncpa [#allocation3 + $0x1], 1 }

</bundles_post_ra>
